<compile_context>
chip_gen: v5e
topology: v5e:2x2
jax: 0.10.0
libtpu: 0.0.40
codegen_flags: <defaults>
</compile_context>

<pallas_src>
import functools

import jax
import jax.numpy as jnp
import numpy as np
from jax.experimental import pallas as pl
from jax.experimental.pallas import tpu as pltpu


# ----------------------------- Pallas kernel ------------------------------- #

def _projection_kernel(x_ref, c1_ref, s1_ref, bmap1_ref, c2_ref, s2_ref,
                       b2_ref, g_ref, beta_ref, o_ref, *, C, H, W, eps):
    """One batch sample: Tconv1 -> Tconv2 -> LayerNorm, all in VMEM, MACs on the MXU."""
    W2 = 2 * W            # 40
    W3 = 4 * W            # 80
    x = x_ref[0]          # (C, H, W)

    # ---- Stage 1: ConvTranspose2d(C -> C, k3 s2 p1 op1) : (C,20,20) -> (40, C*40) ----
    # z1[a, (kh, co, ow)] = sum_ci sum_b x[ci, a, b] * Cmat1[ci][b, (kh, co, ow)]
    z1 = jnp.dot(x[0], c1_ref[0], preferred_element_type=jnp.float32)       # (H, 3*C*W2)
    for ci in range(1, C):
        z1 = z1 + jnp.dot(x[ci], c1_ref[ci], preferred_element_type=jnp.float32)
    bw1 = C * W2
    y1 = bmap1_ref[...]                                                     # bias, (2H, C*W2)
    for kh in range(3):
        y1 = y1 + jnp.dot(s1_ref[kh], z1[:, kh * bw1:(kh + 1) * bw1],
                          preferred_element_type=jnp.float32)               # (2H, C*W2)
    # y1 columns are laid out (channel, col) == exactly the contraction layout stage 2 expects.

    # ---- Stage 2: ConvTranspose2d(C -> 1) : (C,40,40) -> (80, 80) ----
    z2 = jnp.dot(y1, c2_ref[...], preferred_element_type=jnp.float32)       # (2H, 3*W3)
    y2 = jnp.dot(s2_ref[0], z2[:, 0:W3], preferred_element_type=jnp.float32)
    for kh in range(1, 3):
        y2 = y2 + jnp.dot(s2_ref[kh], z2[:, kh * W3:(kh + 1) * W3],
                          preferred_element_type=jnp.float32)               # (4H, 4W) = (80, 80)
    y2 = y2 + b2_ref[0]

    # ---- LayerNorm([80, 80]) over the whole plane ----
    mean = jnp.mean(y2)
    yc = y2 - mean
    var = jnp.mean(yc * yc)
    inv = jax.lax.rsqrt(var + eps)
    o_ref[0, 0] = yc * inv * g_ref[...] + beta_ref[...]


# ------------------- Host-side weight-matrix construction ------------------ #

def _row_select_mats(H_in):
    """S[kh]: (2H, H) 0/1 placing input row a at output row oh = 2a + 1 - kh."""
    s = np.zeros((3, 2 * H_in, H_in), np.float32)
    for kh in range(3):
        for a in range(H_in):
            oh = 2 * a + 1 - kh
            if 0 <= oh < 2 * H_in:
                s[kh, oh, a] = 1.0
    return jnp.asarray(s)


def _col_weight_mat(wt, W_in, *, per_channel_lhs):
    """Column-mixing matrix for ConvTranspose2d(k=3, s=2, p=1, op=1) along W.

    wt: PyTorch ConvTranspose2d weight, layout (c_in, c_out, 3, 3).
    Entry [(ci, b), (kh, co, ow)] = wf[co, ci, kh, 2b+1-ow] when 0 <= 2b+1-ow <= 2,
    where wf is the spatially-flipped, IO-transposed kernel.  Returns
    (c_in, W, 3*c_out*2W) if per_channel_lhs else (c_in*W, 3*c_out*2W).
    """
    c_in, c_out = wt.shape[0], wt.shape[1]
    wf = jnp.transpose(jnp.flip(wt, (-2, -1)), (1, 0, 2, 3)).astype(jnp.float32)  # (co, ci, kh, kw)
    ind = np.zeros((W_in, 2 * W_in, 3), np.float32)       # [b, ow, kw] placement indicator
    for b in range(W_in):
        for ow in range(2 * W_in):
            kw = 2 * b + 1 - ow
            if 0 <= kw <= 2:
                ind[b, ow, kw] = 1.0
    cm = jnp.einsum("oihl,bwl->ibhow", wf, jnp.asarray(ind))   # (ci, b, kh, co, ow)
    if per_channel_lhs:
        return cm.reshape(c_in, W_in, 3 * c_out * 2 * W_in)
    return cm.reshape(c_in * W_in, 3 * c_out * 2 * W_in)


# --------------------------------- Wrapper ---------------------------------- #

@jax.jit
def projection_layer(x, p, eps=1e-5):
    N, C, H, W = x.shape
    assert (4 * H, 4 * W) == (80, 80), "ProjectionLayer requires 20x20 spatial input"

    c1 = _col_weight_mat(p["wt1"], W, per_channel_lhs=True)          # (C, 20, 3*C*40)
    s1 = _row_select_mats(H)                                         # (3, 40, 20)
    bmap1 = jnp.broadcast_to(
        jnp.repeat(p["b1"].astype(jnp.float32), 2 * W)[None, :], (2 * H, C * 2 * W))
    c2 = _col_weight_mat(p["wt2"], 2 * W, per_channel_lhs=False)     # (C*40, 3*80)
    s2 = _row_select_mats(2 * H)                                     # (3, 80, 40)
    b2 = p["b2"].astype(jnp.float32).reshape(1)

    kern = functools.partial(_projection_kernel, C=C, H=H, W=W, eps=eps)
    return pl.pallas_call(
        kern,
        out_shape=jax.ShapeDtypeStruct((N, 1, 4 * H, 4 * W), jnp.float32),
        grid=(N,),
        in_specs=[
            pl.BlockSpec((1, C, H, W), lambda n: (n, 0, 0, 0)),              # x (per sample)
            pl.BlockSpec(c1.shape, lambda n: (0, 0, 0)),                     # stage-1 col matrix
            pl.BlockSpec(s1.shape, lambda n: (0, 0, 0)),                     # stage-1 row placement
            pl.BlockSpec(bmap1.shape, lambda n: (0, 0)),                     # stage-1 bias map
            pl.BlockSpec(c2.shape, lambda n: (0, 0)),                        # stage-2 col matrix
            pl.BlockSpec(s2.shape, lambda n: (0, 0, 0)),                     # stage-2 row placement
            pl.BlockSpec(memory_space=pltpu.MemorySpace.SMEM),               # stage-2 bias scalar
            pl.BlockSpec((4 * H, 4 * W), lambda n: (0, 0)),                  # LN gamma
            pl.BlockSpec((4 * H, 4 * W), lambda n: (0, 0)),                  # LN beta
        ],
        out_specs=pl.BlockSpec((1, 1, 4 * H, 4 * W), lambda n: (n, 0, 0, 0)),
        compiler_params=pltpu.CompilerParams(dimension_semantics=("parallel",)),
    )(x.astype(jnp.float32), c1, s1, bmap1, c2, s2, b2,
      p["ln_g"].astype(jnp.float32), p["ln_b"].astype(jnp.float32))


# ---------------------- Pure-JAX reference (sanity) ------------------------ #

def _ref_convtrans(x, wt, b):
    wc = jnp.flip(wt, axis=(-2, -1)).transpose(1, 0, 2, 3)
    y = jax.lax.conv_general_dilated(
        x, wc, window_strides=(1, 1), padding=((1, 2), (1, 2)),
        lhs_dilation=(2, 2), dimension_numbers=("NCHW", "OIHW", "NCHW"),
        precision=jax.lax.Precision.HIGHEST)
    return y + b[None, :, None, None]


def _ref_forward(x, p, eps=1e-5):
    y = _ref_convtrans(x, p["wt1"], p["b1"])
    y = _ref_convtrans(y, p["wt2"], p["b2"])
    mean = jnp.mean(y, axis=(-2, -1), keepdims=True)
    var = jnp.mean((y - mean) ** 2, axis=(-2, -1), keepdims=True)
    return (y - mean) * jax.lax.rsqrt(var + eps) * p["ln_g"] + p["ln_b"]


# --------------------------------- Main ------------------------------------ #

if __name__ == "__main__":
    hidden = 4      # hidden_channel
    N = 2
    H = W = 20      # 20 -> 40 -> 80, required by LayerNorm([80, 80])

    key = jax.random.PRNGKey(0)
    k_x, k_w1, k_b1, k_w2, k_b2, k_g, k_b = jax.random.split(key, 7)

    x = jax.random.normal(k_x, (N, hidden, H, W), dtype=jnp.float32)
    params = {
        # ConvTranspose2d weight layout: (C_in, C_out, kH, kW)
        "wt1": 0.1 * jax.random.normal(k_w1, (hidden, hidden, 3, 3), dtype=jnp.float32),
        "b1": 0.1 * jax.random.normal(k_b1, (hidden,), dtype=jnp.float32),
        "wt2": 0.1 * jax.random.normal(k_w2, (hidden, 1, 3, 3), dtype=jnp.float32),
        "b2": 0.1 * jax.random.normal(k_b2, (1,), dtype=jnp.float32),
        "ln_g": 1.0 + 0.05 * jax.random.normal(k_g, (80, 80), dtype=jnp.float32),
        "ln_b": 0.05 * jax.random.normal(k_b, (80, 80), dtype=jnp.float32),
    }

    out = projection_layer(x, params)
    out = jax.block_until_ready(out)
    assert out.shape == (N, 1, 80, 80), out.shape

    ref = jax.block_until_ready(_ref_forward(x, params))
    # MXU matmul rounding differs slightly from the HIGHEST-precision XLA reference.
    np.testing.assert_allclose(np.asarray(out), np.asarray(ref), rtol=1e-2, atol=1e-2)

    print("KERNEL_OK")
</pallas_src>

<mosaic_0001>
module attributes {stable_mosaic.version = 11 : i64} {
  func.func @_projection_kernel(%arg0: i32, %arg1: memref<1x4x20x20xf32, #tpu.memory_space<vmem>>, %arg2: memref<4x20x480xf32, #tpu.memory_space<vmem>>, %arg3: memref<3x40x20xf32, #tpu.memory_space<vmem>>, %arg4: memref<40x160xf32, #tpu.memory_space<vmem>>, %arg5: memref<160x240xf32, #tpu.memory_space<vmem>>, %arg6: memref<3x80x40xf32, #tpu.memory_space<vmem>>, %arg7: memref<1xf32, #tpu.memory_space<smem>>, %arg8: memref<80x80xf32, #tpu.memory_space<vmem>>, %arg9: memref<80x80xf32, #tpu.memory_space<vmem>>, %arg10: memref<1x1x80x80xf32, #tpu.memory_space<vmem>>) attributes {dimension_semantics = [#tpu.dimension_semantics<parallel>], iteration_bounds = array<i64: 2>, scalar_prefetch = 0 : i64, scratch_operands = 0 : i64, tpu.core_type = #tpu.core_type<tc>, window_params = [{transform_indices = @transform_0, window_bounds = array<i64: 1, 4, 20, 20>}, {pipeline_mode = #tpu.pipeline_mode<synchronous>, transform_indices = @transform_1, window_bounds = array<i64: 4, 20, 480>}, {pipeline_mode = #tpu.pipeline_mode<synchronous>, transform_indices = @transform_2, window_bounds = array<i64: 3, 40, 20>}, {pipeline_mode = #tpu.pipeline_mode<synchronous>, transform_indices = @transform_3, window_bounds = array<i64: 40, 160>}, {pipeline_mode = #tpu.pipeline_mode<synchronous>, transform_indices = @transform_4, window_bounds = array<i64: 160, 240>}, {pipeline_mode = #tpu.pipeline_mode<synchronous>, transform_indices = @transform_5, window_bounds = array<i64: 3, 80, 40>}, {transform_indices = @transform_6, window_bounds = array<i64: 1>}, {pipeline_mode = #tpu.pipeline_mode<synchronous>, transform_indices = @transform_7, window_bounds = array<i64: 80, 80>}, {pipeline_mode = #tpu.pipeline_mode<synchronous>, transform_indices = @transform_8, window_bounds = array<i64: 80, 80>}, {transform_indices = @transform_9, window_bounds = array<i64: 1, 1, 80, 80>}]} {
    %c0 = arith.constant 0 : index
    %c0_0 = arith.constant 0 : index
    %c0_1 = arith.constant 0 : index
    %c0_2 = arith.constant 0 : index
    %0 = vector.load %arg1[%c0, %c0_0, %c0_1, %c0_2] : memref<1x4x20x20xf32, #tpu.memory_space<vmem>>, vector<1x4x20x20xf32>
    %1 = vector.shape_cast %0 : vector<1x4x20x20xf32> to vector<4x20x20xf32>
    %2 = vector.extract_strided_slice %1 {offsets = [0, 0, 0], sizes = [1, 20, 20], strides = [1, 1, 1]} : vector<4x20x20xf32> to vector<1x20x20xf32>
    %3 = vector.shape_cast %2 : vector<1x20x20xf32> to vector<20x20xf32>
    %c0_3 = arith.constant 0 : index
    %c0_4 = arith.constant 0 : index
    %c0_5 = arith.constant 0 : index
    %4 = vector.load %arg2[%c0_3, %c0_4, %c0_5] : memref<4x20x480xf32, #tpu.memory_space<vmem>>, vector<1x20x480xf32>
    %5 = vector.shape_cast %4 : vector<1x20x480xf32> to vector<20x480xf32>
    %cst = arith.constant dense<0.000000e+00> : vector<20x480xf32>
    %6 = tpu.matmul %3, %5, %cst {dimension_numbers = #tpu.dot_dimension_numbers<[1], [0], [0], [1], [0, 0, 1, 1], [], []>} : vector<20x20xf32>, vector<20x480xf32>, vector<20x480xf32> -> vector<20x480xf32>
    %7 = vector.extract_strided_slice %1 {offsets = [1, 0, 0], sizes = [1, 20, 20], strides = [1, 1, 1]} : vector<4x20x20xf32> to vector<1x20x20xf32>
    %8 = vector.shape_cast %7 : vector<1x20x20xf32> to vector<20x20xf32>
    %c1 = arith.constant 1 : index
    %c0_6 = arith.constant 0 : index
    %c0_7 = arith.constant 0 : index
    %9 = vector.load %arg2[%c1, %c0_6, %c0_7] : memref<4x20x480xf32, #tpu.memory_space<vmem>>, vector<1x20x480xf32>
    %10 = vector.shape_cast %9 : vector<1x20x480xf32> to vector<20x480xf32>
    %cst_8 = arith.constant dense<0.000000e+00> : vector<20x480xf32>
    %11 = tpu.matmul %8, %10, %cst_8 {dimension_numbers = #tpu.dot_dimension_numbers<[1], [0], [0], [1], [0, 0, 1, 1], [], []>} : vector<20x20xf32>, vector<20x480xf32>, vector<20x480xf32> -> vector<20x480xf32>
    %12 = arith.addf %6, %11 : vector<20x480xf32>
    %13 = vector.extract_strided_slice %1 {offsets = [2, 0, 0], sizes = [1, 20, 20], strides = [1, 1, 1]} : vector<4x20x20xf32> to vector<1x20x20xf32>
    %14 = vector.shape_cast %13 : vector<1x20x20xf32> to vector<20x20xf32>
    %c2 = arith.constant 2 : index
    %c0_9 = arith.constant 0 : index
    %c0_10 = arith.constant 0 : index
    %15 = vector.load %arg2[%c2, %c0_9, %c0_10] : memref<4x20x480xf32, #tpu.memory_space<vmem>>, vector<1x20x480xf32>
    %16 = vector.shape_cast %15 : vector<1x20x480xf32> to vector<20x480xf32>
    %cst_11 = arith.constant dense<0.000000e+00> : vector<20x480xf32>
    %17 = tpu.matmul %14, %16, %cst_11 {dimension_numbers = #tpu.dot_dimension_numbers<[1], [0], [0], [1], [0, 0, 1, 1], [], []>} : vector<20x20xf32>, vector<20x480xf32>, vector<20x480xf32> -> vector<20x480xf32>
    %18 = arith.addf %12, %17 : vector<20x480xf32>
    %19 = vector.extract_strided_slice %1 {offsets = [3, 0, 0], sizes = [1, 20, 20], strides = [1, 1, 1]} : vector<4x20x20xf32> to vector<1x20x20xf32>
    %20 = vector.shape_cast %19 : vector<1x20x20xf32> to vector<20x20xf32>
    %c3 = arith.constant 3 : index
    %c0_12 = arith.constant 0 : index
    %c0_13 = arith.constant 0 : index
    %21 = vector.load %arg2[%c3, %c0_12, %c0_13] : memref<4x20x480xf32, #tpu.memory_space<vmem>>, vector<1x20x480xf32>
    %22 = vector.shape_cast %21 : vector<1x20x480xf32> to vector<20x480xf32>
    %cst_14 = arith.constant dense<0.000000e+00> : vector<20x480xf32>
    %23 = tpu.matmul %20, %22, %cst_14 {dimension_numbers = #tpu.dot_dimension_numbers<[1], [0], [0], [1], [0, 0, 1, 1], [], []>} : vector<20x20xf32>, vector<20x480xf32>, vector<20x480xf32> -> vector<20x480xf32>
    %24 = arith.addf %18, %23 : vector<20x480xf32>
    %c0_15 = arith.constant 0 : index
    %c0_16 = arith.constant 0 : index
    %25 = vector.load %arg4[%c0_15, %c0_16] : memref<40x160xf32, #tpu.memory_space<vmem>>, vector<40x160xf32>
    %c0_17 = arith.constant 0 : index
    %c0_18 = arith.constant 0 : index
    %c0_19 = arith.constant 0 : index
    %26 = vector.load %arg3[%c0_17, %c0_18, %c0_19] : memref<3x40x20xf32, #tpu.memory_space<vmem>>, vector<1x40x20xf32>
    %27 = vector.shape_cast %26 : vector<1x40x20xf32> to vector<40x20xf32>
    %28 = vector.extract_strided_slice %24 {offsets = [0, 0], sizes = [20, 160], strides = [1, 1]} : vector<20x480xf32> to vector<20x160xf32>
    %cst_20 = arith.constant dense<0.000000e+00> : vector<40x160xf32>
    %29 = tpu.matmul %27, %28, %cst_20 {dimension_numbers = #tpu.dot_dimension_numbers<[1], [0], [0], [1], [0, 0, 1, 1], [], []>} : vector<40x20xf32>, vector<20x160xf32>, vector<40x160xf32> -> vector<40x160xf32>
    %30 = arith.addf %25, %29 : vector<40x160xf32>
    %c1_21 = arith.constant 1 : index
    %c0_22 = arith.constant 0 : index
    %c0_23 = arith.constant 0 : index
    %31 = vector.load %arg3[%c1_21, %c0_22, %c0_23] : memref<3x40x20xf32, #tpu.memory_space<vmem>>, vector<1x40x20xf32>
    %32 = vector.shape_cast %31 : vector<1x40x20xf32> to vector<40x20xf32>
    %33 = vector.extract_strided_slice %24 {offsets = [0, 160], sizes = [20, 160], strides = [1, 1]} : vector<20x480xf32> to vector<20x160xf32>
    %cst_24 = arith.constant dense<0.000000e+00> : vector<40x160xf32>
    %34 = tpu.matmul %32, %33, %cst_24 {dimension_numbers = #tpu.dot_dimension_numbers<[1], [0], [0], [1], [0, 0, 1, 1], [], []>} : vector<40x20xf32>, vector<20x160xf32>, vector<40x160xf32> -> vector<40x160xf32>
    %35 = arith.addf %30, %34 : vector<40x160xf32>
    %c2_25 = arith.constant 2 : index
    %c0_26 = arith.constant 0 : index
    %c0_27 = arith.constant 0 : index
    %36 = vector.load %arg3[%c2_25, %c0_26, %c0_27] : memref<3x40x20xf32, #tpu.memory_space<vmem>>, vector<1x40x20xf32>
    %37 = vector.shape_cast %36 : vector<1x40x20xf32> to vector<40x20xf32>
    %38 = vector.extract_strided_slice %24 {offsets = [0, 320], sizes = [20, 160], strides = [1, 1]} : vector<20x480xf32> to vector<20x160xf32>
    %cst_28 = arith.constant dense<0.000000e+00> : vector<40x160xf32>
    %39 = tpu.matmul %37, %38, %cst_28 {dimension_numbers = #tpu.dot_dimension_numbers<[1], [0], [0], [1], [0, 0, 1, 1], [], []>} : vector<40x20xf32>, vector<20x160xf32>, vector<40x160xf32> -> vector<40x160xf32>
    %40 = arith.addf %35, %39 : vector<40x160xf32>
    %c0_29 = arith.constant 0 : index
    %c0_30 = arith.constant 0 : index
    %41 = vector.load %arg5[%c0_29, %c0_30] : memref<160x240xf32, #tpu.memory_space<vmem>>, vector<160x240xf32>
    %cst_31 = arith.constant dense<0.000000e+00> : vector<40x240xf32>
    %42 = tpu.matmul %40, %41, %cst_31 {dimension_numbers = #tpu.dot_dimension_numbers<[1], [0], [0], [1], [0, 0, 1, 1], [], []>} : vector<40x160xf32>, vector<160x240xf32>, vector<40x240xf32> -> vector<40x240xf32>
    %c0_32 = arith.constant 0 : index
    %c0_33 = arith.constant 0 : index
    %c0_34 = arith.constant 0 : index
    %43 = vector.load %arg6[%c0_32, %c0_33, %c0_34] : memref<3x80x40xf32, #tpu.memory_space<vmem>>, vector<1x80x40xf32>
    %44 = vector.shape_cast %43 : vector<1x80x40xf32> to vector<80x40xf32>
    %45 = vector.extract_strided_slice %42 {offsets = [0, 0], sizes = [40, 80], strides = [1, 1]} : vector<40x240xf32> to vector<40x80xf32>
    %cst_35 = arith.constant dense<0.000000e+00> : vector<80x80xf32>
    %46 = tpu.matmul %44, %45, %cst_35 {dimension_numbers = #tpu.dot_dimension_numbers<[1], [0], [0], [1], [0, 0, 1, 1], [], []>} : vector<80x40xf32>, vector<40x80xf32>, vector<80x80xf32> -> vector<80x80xf32>
    %c1_36 = arith.constant 1 : index
    %c0_37 = arith.constant 0 : index
    %c0_38 = arith.constant 0 : index
    %47 = vector.load %arg6[%c1_36, %c0_37, %c0_38] : memref<3x80x40xf32, #tpu.memory_space<vmem>>, vector<1x80x40xf32>
    %48 = vector.shape_cast %47 : vector<1x80x40xf32> to vector<80x40xf32>
    %49 = vector.extract_strided_slice %42 {offsets = [0, 80], sizes = [40, 80], strides = [1, 1]} : vector<40x240xf32> to vector<40x80xf32>
    %cst_39 = arith.constant dense<0.000000e+00> : vector<80x80xf32>
    %50 = tpu.matmul %48, %49, %cst_39 {dimension_numbers = #tpu.dot_dimension_numbers<[1], [0], [0], [1], [0, 0, 1, 1], [], []>} : vector<80x40xf32>, vector<40x80xf32>, vector<80x80xf32> -> vector<80x80xf32>
    %51 = arith.addf %46, %50 : vector<80x80xf32>
    %c2_40 = arith.constant 2 : index
    %c0_41 = arith.constant 0 : index
    %c0_42 = arith.constant 0 : index
    %52 = vector.load %arg6[%c2_40, %c0_41, %c0_42] : memref<3x80x40xf32, #tpu.memory_space<vmem>>, vector<1x80x40xf32>
    %53 = vector.shape_cast %52 : vector<1x80x40xf32> to vector<80x40xf32>
    %54 = vector.extract_strided_slice %42 {offsets = [0, 160], sizes = [40, 80], strides = [1, 1]} : vector<40x240xf32> to vector<40x80xf32>
    %cst_43 = arith.constant dense<0.000000e+00> : vector<80x80xf32>
    %55 = tpu.matmul %53, %54, %cst_43 {dimension_numbers = #tpu.dot_dimension_numbers<[1], [0], [0], [1], [0, 0, 1, 1], [], []>} : vector<80x40xf32>, vector<40x80xf32>, vector<80x80xf32> -> vector<80x80xf32>
    %56 = arith.addf %51, %55 : vector<80x80xf32>
    %c0_44 = arith.constant 0 : index
    %57 = memref.load %arg7[%c0_44] : memref<1xf32, #tpu.memory_space<smem>>
    %58 = vector.broadcast %57 : f32 to vector<80x80xf32>
    %59 = arith.addf %56, %58 : vector<80x80xf32>
    %60 = vector.shape_cast %59 : vector<80x80xf32> to vector<1x80x80xf32>
    %cst_45 = arith.constant dense<0.000000e+00> : vector<1xf32>
    %61 = vector.multi_reduction <add>, %60, %cst_45 [1, 2] : vector<1x80x80xf32> to vector<1xf32>
    %62 = vector.shape_cast %61 : vector<1xf32> to vector<1x1x1xf32>
    %63 = vector.extract %62[0, 0, 0] : f32 from vector<1x1x1xf32>
    %cst_46 = arith.constant 6.400000e+03 : f32
    %64 = arith.divf %63, %cst_46 : f32
    %65 = vector.broadcast %64 : f32 to vector<80x80xf32>
    %66 = arith.subf %59, %65 : vector<80x80xf32>
    %67 = arith.mulf %66, %66 : vector<80x80xf32>
    %68 = vector.shape_cast %67 : vector<80x80xf32> to vector<1x80x80xf32>
    %cst_47 = arith.constant dense<0.000000e+00> : vector<1xf32>
    %69 = vector.multi_reduction <add>, %68, %cst_47 [1, 2] : vector<1x80x80xf32> to vector<1xf32>
    %70 = vector.shape_cast %69 : vector<1xf32> to vector<1x1x1xf32>
    %71 = vector.extract %70[0, 0, 0] : f32 from vector<1x1x1xf32>
    %cst_48 = arith.constant 6.400000e+03 : f32
    %72 = arith.divf %71, %cst_48 : f32
    %cst_49 = arith.constant 9.99999974E-6 : f32
    %73 = arith.addf %72, %cst_49 : f32
    %74 = math.rsqrt %73 : f32
    %75 = vector.broadcast %74 : f32 to vector<80x80xf32>
    %76 = arith.mulf %66, %75 : vector<80x80xf32>
    %c0_50 = arith.constant 0 : index
    %c0_51 = arith.constant 0 : index
    %77 = vector.load %arg8[%c0_50, %c0_51] : memref<80x80xf32, #tpu.memory_space<vmem>>, vector<80x80xf32>
    %78 = arith.mulf %76, %77 : vector<80x80xf32>
    %c0_52 = arith.constant 0 : index
    %c0_53 = arith.constant 0 : index
    %79 = vector.load %arg9[%c0_52, %c0_53] : memref<80x80xf32, #tpu.memory_space<vmem>>, vector<80x80xf32>
    %80 = arith.addf %78, %79 : vector<80x80xf32>
    %c0_54 = arith.constant 0 : index
    %c0_55 = arith.constant 0 : index
    %c0_56 = arith.constant 0 : index
    %c0_57 = arith.constant 0 : index
    %81 = vector.load %arg10[%c0_54, %c0_55, %c0_56, %c0_57] : memref<1x1x80x80xf32, #tpu.memory_space<vmem>>, vector<1x1x80x80xf32>
    %82 = vector.shape_cast %81 : vector<1x1x80x80xf32> to vector<80x80xf32>
    %83 = vector.shape_cast %80 : vector<80x80xf32> to vector<1x1x80x80xf32>
    tpu.vector_store %arg10[%c0_54, %c0_55, %c0_56, %c0_57], %83 {strides = array<i32>} : memref<1x1x80x80xf32, #tpu.memory_space<vmem>>, vector<1x1x80x80xf32>,
    return
  }
  func.func @transform_0(%arg0: i32) -> (i32, i32, i32, i32) {
    %c0_i32 = arith.constant 0 : i32
    %c0_i32_0 = arith.constant 0 : i32
    %c0_i32_1 = arith.constant 0 : i32
    %c0_i32_2 = arith.constant 0 : i32
    return %arg0, %c0_i32, %c0_i32_0, %c0_i32_1 : i32, i32, i32, i32
  }
  func.func @transform_1(%arg0: i32) -> (i32, i32, i32) {
    %c0_i32 = arith.constant 0 : i32
    %c0_i32_0 = arith.constant 0 : i32
    %c0_i32_1 = arith.constant 0 : i32
    %c0_i32_2 = arith.constant 0 : i32
    return %c0_i32, %c0_i32_0, %c0_i32_1 : i32, i32, i32
  }
  func.func @transform_2(%arg0: i32) -> (i32, i32, i32) {
    %c0_i32 = arith.constant 0 : i32
    %c0_i32_0 = arith.constant 0 : i32
    %c0_i32_1 = arith.constant 0 : i32
    %c0_i32_2 = arith.constant 0 : i32
    return %c0_i32, %c0_i32_0, %c0_i32_1 : i32, i32, i32
  }
  func.func @transform_3(%arg0: i32) -> (i32, i32) {
    %c0_i32 = arith.constant 0 : i32
    %c0_i32_0 = arith.constant 0 : i32
    %c0_i32_1 = arith.constant 0 : i32
    return %c0_i32, %c0_i32_0 : i32, i32
  }
  func.func @transform_4(%arg0: i32) -> (i32, i32) {
    %c0_i32 = arith.constant 0 : i32
    %c0_i32_0 = arith.constant 0 : i32
    %c0_i32_1 = arith.constant 0 : i32
    return %c0_i32, %c0_i32_0 : i32, i32
  }
  func.func @transform_5(%arg0: i32) -> (i32, i32, i32) {
    %c0_i32 = arith.constant 0 : i32
    %c0_i32_0 = arith.constant 0 : i32
    %c0_i32_1 = arith.constant 0 : i32
    %c0_i32_2 = arith.constant 0 : i32
    return %c0_i32, %c0_i32_0, %c0_i32_1 : i32, i32, i32
  }
  func.func @transform_6(%arg0: i32) -> i32 {
    %c0_i32 = arith.constant 0 : i32
    %c0_i32_0 = arith.constant 0 : i32
    return %c0_i32 : i32
  }
  func.func @transform_7(%arg0: i32) -> (i32, i32) {
    %c0_i32 = arith.constant 0 : i32
    %c0_i32_0 = arith.constant 0 : i32
    %c0_i32_1 = arith.constant 0 : i32
    return %c0_i32, %c0_i32_0 : i32, i32
  }
  func.func @transform_8(%arg0: i32) -> (i32, i32) {
    %c0_i32 = arith.constant 0 : i32
    %c0_i32_0 = arith.constant 0 : i32
    %c0_i32_1 = arith.constant 0 : i32
    return %c0_i32, %c0_i32_0 : i32, i32
  }
  func.func @transform_9(%arg0: i32) -> (i32, i32, i32, i32) {
    %c0_i32 = arith.constant 0 : i32
    %c0_i32_0 = arith.constant 0 : i32
    %c0_i32_1 = arith.constant 0 : i32
    %c0_i32_2 = arith.constant 0 : i32
    return %arg0, %c0_i32, %c0_i32_0, %c0_i32_1 : i32, i32, i32, i32
  }
}

</mosaic_0001>

<bundles_post_ra>
// kernel: projection_layer.1
= control target key start
LH: loop header
LB: loop body
LE: loop exit
PB: predicated region body
PF: predicated region fallthrough
CT: control target
= control target key end

     0   :  { %s3403_s0 = inlined_call_operand.vmem [shape: f32[2,4,20,20], index: 0, kind: input, shape index: {}]   ;;  %s3404_s1 = inlined_call_operand.vmem [shape: f32[4,20,480], index: 1, kind: input, shape index: {}]   ;;  %s3405_s2 = inlined_call_operand.vmem [shape: f32[3,40,20], index: 2, kind: input, shape index: {}]   ;;  %s3406_s3 = inlined_call_operand.vmem [shape: f32[40,160], index: 3, kind: input, shape index: {}]   ;;  %s3407_s4 = inlined_call_operand.vmem [shape: f32[160,240], index: 4, kind: input, shape index: {}]   ;;  %s3408_s5 = inlined_call_operand.vmem [shape: f32[3,80,40], index: 5, kind: input, shape index: {}]   ;;  %s3409_s6 = inlined_call_operand.<no memory space> [shape: f32[1], index: 6, kind: input, shape index: {}]   ;;  %s3410_s7 = inlined_call_operand.vmem [shape: f32[80,80], index: 7, kind: input, shape index: {}]   ;;  %s3411_s8 = inlined_call_operand.vmem [shape: f32[80,80], index: 8, kind: input, shape index: {}]   ;;  %s3412_s9 = inlined_call_operand.hbm [shape: f32[2,1,80,80], index: 9, kind: output, shape index: {}]  }
   0x1   :  { %14 = sst [smem:[#allocation2]] %s3409_s6 }
   0x2   :  { %15 = vsyncpa [#allocation4], 0 }
   0x3   :  { %17 = vsyncpa [#allocation4 + $0x1], 0  ;;  %s2503_s11 = smov 0   ;;  %s2505_s12 = smov 0  }
   0x4   :  { %s2507_s13 = smov 0   ;;  %s2509_s14 = smov 0  }
   0x5 LB: > { %s2524_s6 = sadd.s32 4294967295, %s2442_s14   ;;  %s2051_s15 = sadd.s32 4294967294, %s2442_s14   ;;  %s2442_s14 = sphi %s2509_s14, %s3418_s14   ;;  %s2438_s13 = sphi %s2507_s13, %s3417_s13   ;;  %s2434_s12 = sphi %s2505_s12, %s3416_s12   ;;  %s2430_s11 = sphi %s2503_s11, %s3415_s11  }
   0x6   : > { %s2528_s16 = sadd.s32 1, %s2442_s14   ;;  %s224_s17 = sadd.s32 1, %s2438_s13 }
   0x7   : > { %s221_s18 = ssub.s32 %s2442_s14, %s2528_s16  ;;  %p234_p0 = scmp.ne.s32.totalorder %s2438_s13, %s2434_s12 }
   0x8   : > { %p222_p1 = scmp.eq.s32.totalorder %s221_s18, 0  ;;  %p235_p2 = scmp.eq.s32.totalorder %s2524_s6, 1 }
   0x9   : > { %p240_p3 = scmp.ne.s32.totalorder %s2434_s12, %s2430_s11  ;;  %p241_p4 = scmp.eq.s32.totalorder %s2051_s15, 1 }
   0xa   : > { %s2539_s19 = scalar_select %p222_p1, %s2438_s13, %s224_s17  }
   0xb   : > { %p2541_p5 = por %p235_p2, %p234_p0  ;;  %p2545_p6 = por %p241_p4, %p240_p3 }
   0xc   : > { %p2054_p7 = scmp.ge.s32.totalorder %s2442_s14, 1  ;;  %p291_p8 = scmp.lt.s32.totalorder %s2442_s14, 3 }
   0xe   : > { %p292_p9 = pnand %p2054_p7, %p291_p8 }
   0xf   : > { %p327_p10 = scmp.lt.s32.totalorder (!%p292_p9), %s2524_s6, 1  ;;  %s2445_s26 = smov (!%p292_p9), 64  }
  0x10   : > { %295 = sbr.rel (%p292_p9) target bundleno = 1488 (0x5d0), region = 56  ;;  %s2446_s23 = smov (!%p292_p9), 48  }
  0x11   : > { %s1791_s10 = sld [smem:[#allocation2]] (!%p292_p9)  ;;  %s2275_s29 = smul.u32 (!%p292_p9), 80, %s2524_s6 }
  0x15   : > { %v2064_v0 = vld [vmem:[%s3404_s1 + $0xa0] sm:$0xf]  ;;  %vm379_vm0 = vcmask 1043456   ;;  %v2065_v1 = vld [vmem:[%s3404_s1 + $0xa8] sm:$0xf]  ;;  %v2062_v6 = vld [vmem:[%s3404_s1 + $0x90] sm:$0xff] }
  0x16   : > { %v2060_v2 = vld [vmem:[%s3404_s1 + $0x80] sm:$0xff]  ;;  %2068 = vmatpush.msk.msra.mxu0 %vm379_vm0, %v2064_v0  ;;  %2072 = vmatpush.msk.msra.mxu1 %vm379_vm0, %v2065_v1  ;;  %v2066_v3 = vld [vmem:[%s3404_s1 + $0xb0] sm:$0xf]  ;;  %v2067_v4 = vld [vmem:[%s3404_s1 + $0xb8] sm:$0xf]  ;;  %s328_s17 = scalar_select %p327_p10, %s2524_s6, 1 }
  0x17   : > { %v2061_v5 = vld [vmem:[%s3404_s1 + $0x88] sm:$0xff]  ;;  %2076 = vmatpush.msk.msra.mxu2 %vm379_vm0, %v2066_v3  ;;  %2080 = vmatpush.msk.msra.mxu3 %vm379_vm0, %v2067_v4  ;;  %v2063_v7 = vld [vmem:[%s3404_s1 + $0x98] sm:$0xff]  ;;  %v2056_v8 = vld [vmem:[%s3404_s1 + $0x60] sm:$0xff]  ;;  %vm369_vm1 = vcmask 162816   ;;  %vm1176_vm2 = vcmask 523264   ;;  %vm1054_vm3 = vcmask 785408  }
  0x18   : > { %406 = vmatpush.msra.mxu0 %v2060_v2  ;;  %432 = vmatpush.msra.mxu1 %v2061_v5  ;;  %v2057_v9 = vld [vmem:[%s3404_s1 + $0x68] sm:$0xff]  ;;  %v2058_v10 = vld [vmem:[%s3404_s1 + $0x70] sm:$0xff]  ;;  %v2059_v11 = vld [vmem:[%s3404_s1 + $0x78] sm:$0xff]  ;;  %s2266_s25 = smul.u32 96, %s328_s17  ;;  %vm1317_vm4 = vcmask 261120   ;;  %vm1523_vm5 = vcmask 326656  }
  0x19   : > { %458 = vmatpush.msra.mxu2 %v2062_v6  ;;  %484 = vmatpush.msra.mxu3 %v2063_v7  ;;  %v352_v12 = vld [vmem:[%s3404_s1 + $0x40] sm:$0xf]  ;;  %v353_v13 = vld [vmem:[%s3404_s1 + $0x48] sm:$0xf]  ;;  %v354_v14 = vld [vmem:[%s3404_s1 + $0x50] sm:$0xf] }
  0x1a   : > { %407 = vmatpush.msra.mxu0 %v2056_v8  ;;  %433 = vmatpush.msra.mxu1 %v2057_v9  ;;  %v355_v15 = vld [vmem:[%s3404_s1 + $0x58] sm:$0xf]  ;;  %s2608_s15 = scalar_lea.vmem %s3403_s0, %s2266_s25  ;;  %v348_v17 = vld [vmem:[%s3404_s1 + $0x20] sm:$0xff]  ;;  %v349_v18 = vld [vmem:[%s3404_s1 + $0x28] sm:$0xff]  ;;  %vm1512_vm6 = vcmask 392192   ;;  %vm1803_vm7 = vcmask 654336  }
  0x1b   : > { %459 = vmatpush.msra.mxu2 %v2058_v10  ;;  %485 = vmatpush.msra.mxu3 %v2059_v11  ;;  %v335_v16 = vld [vmem:[%s2608_s15 + $0x18] sm:$0xff]  ;;  %v350_v19 = vld [vmem:[%s3404_s1 + $0x30] sm:$0xff]  ;;  %v344_v21 = vld [vmem:[%s3404_s1] sm:$0xff] }
  0x1c   : > { %2084 = vmatpush.msk.msrb.mxu0 %vm379_vm0, %v352_v12  ;;  %2088 = vmatpush.msk.msrb.mxu1 %vm379_vm0, %v353_v13  ;;  %v351_v20 = vld [vmem:[%s3404_s1 + $0x38] sm:$0xff]  ;;  %v345_v22 = vld [vmem:[%s3404_s1 + $0x8] sm:$0xff]  ;;  %v346_v23 = vld [vmem:[%s3404_s1 + $0x10] sm:$0xff] }
  0x1d   : > { %2092 = vmatpush.msk.msrb.mxu2 %vm379_vm0, %v354_v14  ;;  %2096 = vmatpush.msk.msrb.mxu3 %vm379_vm0, %v355_v15  ;;  %v347_v24 = vld [vmem:[%s3404_s1 + $0x18] sm:$0xff]  ;;  %v336_v25 = vld [vmem:[%s2608_s15 + $0x20] sm:$0xff]  ;;  %v2109_v27 = vld [vmem:[%s3404_s1 + $0x108] sm:$0xf] }
  0x1e   : > { %2069 = vmatmul.msk.f32.vlgmr.msra.gmra.mxu0 %vm369_vm1, %v335_v16  ;;  %2073 = vmatmul.msk.f32.vlgmr.msra.gmra.mxu1 %vm369_vm1, %v335_v16  ;;  %v2108_v26 = vld [vmem:[%s3404_s1 + $0x100] sm:$0xf]  ;;  %v2110_v28 = vld [vmem:[%s3404_s1 + $0x110] sm:$0xf]  ;;  %v2111_v29 = vld [vmem:[%s3404_s1 + $0x118] sm:$0xf] }
  0x1f   : > { %2077 = vmatmul.msk.f32.vlgmr.msra.gmra.mxu2 %vm369_vm1, %v335_v16  ;;  %2081 = vmatmul.msk.f32.vlgmr.msra.gmra.mxu3 %vm369_vm1, %v335_v16  ;;  %v2104_v30 = vld [vmem:[%s3404_s1 + $0xe0] sm:$0xff]  ;;  %v2105_v31 = vld [vmem:[%s3404_s1 + $0xe8] sm:$0xff]  ;;  %v2106_v32 = vld [vmem:[%s3404_s1 + $0xf0] sm:$0xff] }
  0x20   : > { %531 = vmatpush.msrb.mxu0 %v348_v17  ;;  %557 = vmatpush.msrb.mxu1 %v349_v18  ;;  %v2107_v33 = vld [vmem:[%s3404_s1 + $0xf8] sm:$0xff]  ;;  %v2100_v34 = vld [vmem:[%s3404_s1 + $0xc0] sm:$0xff]  ;;  %v2101_v35 = vld [vmem:[%s3404_s1 + $0xc8] sm:$0xff] }
  0x21   : > { %583 = vmatpush.msrb.mxu2 %v350_v19  ;;  %609 = vmatpush.msrb.mxu3 %v351_v20  ;;  %v2102_v36 = vld [vmem:[%s3404_s1 + $0xd0] sm:$0xff]  ;;  %v2103_v37 = vld [vmem:[%s3404_s1 + $0xd8] sm:$0xff]  ;;  %v337_v38 = vld [vmem:[%s2608_s15 + $0x28] sm:$0xf] }
  0x22   : > { %532 = vmatpush.msrb.mxu0 %v344_v21  ;;  %558 = vmatpush.msrb.mxu1 %v345_v22  ;;  %v332_v39 = vld [vmem:[%s2608_s15] sm:$0xff]  ;;  %v333_v40 = vld [vmem:[%s2608_s15 + $0x8] sm:$0xff]  ;;  %v2138_v43 = vld [vmem:[%s3404_s1 + $0x170] sm:$0xf] }
  0x23   : > { %584 = vmatpush.msrb.mxu2 %v346_v23  ;;  %610 = vmatpush.msrb.mxu3 %v347_v24  ;;  %v2136_v41 = vld [vmem:[%s3404_s1 + $0x160] sm:$0xf]  ;;  %v2137_v42 = vld [vmem:[%s3404_s1 + $0x168] sm:$0xf]  ;;  %v2139_v44 = vld [vmem:[%s3404_s1 + $0x178] sm:$0xf] }
  0x24   : > { %2112 = vmatpush.msk.msra.mxu0 %vm379_vm0, %v2108_v26  ;;  %2116 = vmatpush.msk.msra.mxu1 %vm379_vm0, %v2109_v27  ;;  %v2132_v45 = vld [vmem:[%s3404_s1 + $0x140] sm:$0xff]  ;;  %v2133_v46 = vld [vmem:[%s3404_s1 + $0x148] sm:$0xff]  ;;  %v2134_v47 = vld [vmem:[%s3404_s1 + $0x150] sm:$0xff] }
  0x25   : > { %2120 = vmatpush.msk.msra.mxu2 %vm379_vm0, %v2110_v28  ;;  %2124 = vmatpush.msk.msra.mxu3 %vm379_vm0, %v2111_v29  ;;  %v2135_v48 = vld [vmem:[%s3404_s1 + $0x158] sm:$0xff]  ;;  %v2128_v49 = vld [vmem:[%s3404_s1 + $0x120] sm:$0xff]  ;;  %v2129_v50 = vld [vmem:[%s3404_s1 + $0x128] sm:$0xff] }
  0x26   : > { %2070 = vmatmul.msk.f32.gmra.mxu0 %vm369_vm1, %v336_v25  ;;  %2074 = vmatmul.msk.f32.gmra.mxu1 %vm369_vm1, %v336_v25  ;;  %v2130_v51 = vld [vmem:[%s3404_s1 + $0x130] sm:$0xff]  ;;  %v2131_v52 = vld [vmem:[%s3404_s1 + $0x138] sm:$0xff]  ;;  %v340_v56 = vld [vmem:[%s2608_s15 + $0x40] sm:$0xf] }
  0x27   : > { %2078 = vmatmul.msk.f32.gmra.mxu2 %vm369_vm1, %v336_v25  ;;  %2082 = vmatmul.msk.f32.gmra.mxu3 %vm369_vm1, %v336_v25  ;;  %v334_v53 = vld [vmem:[%s2608_s15 + $0x10] sm:$0xf]  ;;  %v339_v55 = vld [vmem:[%s2608_s15 + $0x38] sm:$0xff]  ;;  %v341_v57 = vld [vmem:[%s2608_s15 + $0x48] sm:$0xff] }
  0x28   : > { %669 = vmatpush.msra.mxu0 %v2104_v30  ;;  %695 = vmatpush.msra.mxu1 %v2105_v31  ;;  %v338_v54 = vld [vmem:[%s2608_s15 + $0x30] sm:$0xff]  ;;  %v343_v59 = vld [vmem:[%s2608_s15 + $0x58] sm:$0xf] }
  0x29   : > { %721 = vmatpush.msra.mxu2 %v2106_v32  ;;  %747 = vmatpush.msra.mxu3 %v2107_v33  ;;  %v342_v58 = vld [vmem:[%s2608_s15 + $0x50] sm:$0xff]  ;;  %s2444_s15 = smov 96  }
  0x2a   : > { %670 = vmatpush.msra.mxu0 %v2100_v34  ;;  %696 = vmatpush.msra.mxu1 %v2101_v35 }
  0x2b   : > { %722 = vmatpush.msra.mxu2 %v2102_v36  ;;  %748 = vmatpush.msra.mxu3 %v2103_v37 }
  0x2e   : > { %2071 = vmatmul.msk.f32.gmra.mxu0 %vm369_vm1, %v337_v38  ;;  %2075 = vmatmul.msk.f32.gmra.mxu1 %vm369_vm1, %v337_v38 }
  0x2f   : > { %2079 = vmatmul.msk.f32.gmra.mxu2 %vm369_vm1, %v337_v38  ;;  %2083 = vmatmul.msk.f32.gmra.mxu3 %vm369_vm1, %v337_v38 }
  0x36   : > { %2085 = vmatmul.msk.f32.vlgmr.msrb.gmra.mxu0 %vm369_vm1, %v332_v39  ;;  %2089 = vmatmul.msk.f32.vlgmr.msrb.gmra.mxu1 %vm369_vm1, %v332_v39 }
  0x37   : > { %2093 = vmatmul.msk.f32.vlgmr.msrb.gmra.mxu2 %vm369_vm1, %v332_v39  ;;  %2097 = vmatmul.msk.f32.vlgmr.msrb.gmra.mxu3 %vm369_vm1, %v332_v39 }
  0x38   : > { %2140 = vmatpush.msk.msrb.mxu0 %vm379_vm0, %v2136_v41  ;;  %2144 = vmatpush.msk.msrb.mxu1 %vm379_vm0, %v2137_v42 }
  0x39   : > { %2148 = vmatpush.msk.msrb.mxu2 %vm379_vm0, %v2138_v43  ;;  %2152 = vmatpush.msk.msrb.mxu3 %vm379_vm0, %v2139_v44 }
  0x3a   : > { %819 = vmatpush.msrb.mxu0 %v2132_v45  ;;  %845 = vmatpush.msrb.mxu1 %v2133_v46 }
  0x3b   : > { %871 = vmatpush.msrb.mxu2 %v2134_v47  ;;  %897 = vmatpush.msrb.mxu3 %v2135_v48 }
  0x3c   : > { %820 = vmatpush.msrb.mxu0 %v2128_v49  ;;  %846 = vmatpush.msrb.mxu1 %v2129_v50 }
  0x3d   : > { %872 = vmatpush.msrb.mxu2 %v2130_v51  ;;  %898 = vmatpush.msrb.mxu3 %v2131_v52 }
  0x3e   : > { %2086 = vmatmul.msk.f32.gmra.mxu0 %vm369_vm1, %v333_v40  ;;  %2090 = vmatmul.msk.f32.gmra.mxu1 %vm369_vm1, %v333_v40 }
  0x3f   : > { %2094 = vmatmul.msk.f32.gmra.mxu2 %vm369_vm1, %v333_v40  ;;  %2098 = vmatmul.msk.f32.gmra.mxu3 %vm369_vm1, %v333_v40 }
  0x46   : > { %2087 = vmatmul.msk.f32.gmra.mxu0 %vm369_vm1, %v334_v53  ;;  %2091 = vmatmul.msk.f32.gmra.mxu1 %vm369_vm1, %v334_v53 }
  0x47   : > { %2095 = vmatmul.msk.f32.gmra.mxu2 %vm369_vm1, %v334_v53  ;;  %2099 = vmatmul.msk.f32.gmra.mxu3 %vm369_vm1, %v334_v53 }
  0x4e   : > { %2113 = vmatmul.msk.f32.vlgmr.msra.gmra.mxu0 %vm369_vm1, %v338_v54  ;;  %2117 = vmatmul.msk.f32.vlgmr.msra.gmra.mxu1 %vm369_vm1, %v338_v54 }
  0x4f   : > { %2121 = vmatmul.msk.f32.vlgmr.msra.gmra.mxu2 %vm369_vm1, %v338_v54  ;;  %2125 = vmatmul.msk.f32.vlgmr.msra.gmra.mxu3 %vm369_vm1, %v338_v54 }
  0x56   : > { %2114 = vmatmul.msk.f32.gmra.mxu0 %vm369_vm1, %v339_v55  ;;  %2118 = vmatmul.msk.f32.gmra.mxu1 %vm369_vm1, %v339_v55 }
  0x57   : > { %2122 = vmatmul.msk.f32.gmra.mxu2 %vm369_vm1, %v339_v55  ;;  %2126 = vmatmul.msk.f32.gmra.mxu3 %vm369_vm1, %v339_v55 }
  0x5e   : > { %2115 = vmatmul.msk.f32.gmra.mxu0 %vm369_vm1, %v340_v56  ;;  %2119 = vmatmul.msk.f32.gmra.mxu1 %vm369_vm1, %v340_v56 }
  0x5f   : > { %2123 = vmatmul.msk.f32.gmra.mxu2 %vm369_vm1, %v340_v56  ;;  %2127 = vmatmul.msk.f32.gmra.mxu3 %vm369_vm1, %v340_v56 }
  0x66   : > { %2141 = vmatmul.msk.f32.vlgmr.msrb.gmra.mxu0 %vm369_vm1, %v341_v57  ;;  %2145 = vmatmul.msk.f32.vlgmr.msrb.gmra.mxu1 %vm369_vm1, %v341_v57 }
  0x67   : > { %2149 = vmatmul.msk.f32.vlgmr.msrb.gmra.mxu2 %vm369_vm1, %v341_v57  ;;  %2153 = vmatmul.msk.f32.vlgmr.msrb.gmra.mxu3 %vm369_vm1, %v341_v57 }
  0x6e   : > { %2142 = vmatmul.msk.f32.gmra.mxu0 %vm369_vm1, %v342_v58  ;;  %2146 = vmatmul.msk.f32.gmra.mxu1 %vm369_vm1, %v342_v58 }
  0x6f   : > { %2150 = vmatmul.msk.f32.gmra.mxu2 %vm369_vm1, %v342_v58  ;;  %2154 = vmatmul.msk.f32.gmra.mxu3 %vm369_vm1, %v342_v58 }
  0x76   : > { %2143 = vmatmul.msk.f32.gmra.mxu0 %vm369_vm1, %v343_v59  ;;  %2147 = vmatmul.msk.f32.gmra.mxu1 %vm369_vm1, %v343_v59 }
  0x77   : > { %2151 = vmatmul.msk.f32.gmra.mxu2 %vm369_vm1, %v343_v59  ;;  %2155 = vmatmul.msk.f32.gmra.mxu3 %vm369_vm1, %v343_v59 }
  0x9b   : > { %v409_v60 = vpop.f32.mrf.mxu0  ;;  %v2778_v61 = vpop.f32.mrf.mxu1 }
  0xa2   : > { %v461_v62 = vpop.f32.mrf.mxu2  ;;  %v2780_v63 = vpop.f32.mrf.mxu3 }
  0xa3   : > { %v412_v0 = vpop.f32.mrf.mxu0  ;;  %v438_v1 = vpop.f32.mrf.mxu1 }
  0xaa   : > { %v464_v2 = vpop.f32.mrf.mxu2  ;;  %v2782_v3 = vpop.f32.mrf.mxu3 }
  0xab   : > { %v415_v4 = vpop.f32.mrf.mxu0  ;;  %v441_v5 = vpop.f32.mrf.mxu1 }
  0xb2   : > { %v467_v6 = vpop.f32.mrf.mxu2  ;;  %v2784_v7 = vpop.f32.mrf.mxu3 }
  0xb3   : > { %v534_v8 = vpop.f32.mrf.mxu0  ;;  %v560_v9 = vpop.f32.mrf.mxu1 }
  0xb4   : > { %v535_v45 = vadd.f32 %v534_v8, %v409_v60  ;;  %v561_v60 = vadd.f32 %v560_v9, %v2778_v61 }
  0xba   : > { %v586_v10 = vpop.f32.mrf.mxu2  ;;  %v2786_v11 = vpop.f32.mrf.mxu3 }
  0xbb   : > { %v537_v12 = vpop.f32.mrf.mxu0  ;;  %v563_v13 = vpop.f32.mrf.mxu1  ;;  %v587_v56 = vadd.f32 %v586_v10, %v461_v62  ;;  %v931_v10 = vld [vmem:[%s3405_s2] sm:$0xff] }
  0xbc   : > { %v564_v39 = vadd.f32 %v563_v13, %v438_v1  ;;  %v538_v41 = vadd.f32 %v537_v12, %v412_v0 }
  0xc2   : > { %v589_v14 = vpop.f32.mrf.mxu2  ;;  %v2788_v15 = vpop.f32.mrf.mxu3 }
  0xc3   : > { %v540_v16 = vpop.f32.mrf.mxu0  ;;  %v566_v17 = vpop.f32.mrf.mxu1  ;;  %v590_v40 = vadd.f32 %v589_v14, %v464_v2  ;;  %v616_v61 = vadd.f32 %v2788_v15, %v2782_v3 }
  0xc4   : > { %v541_v38 = vadd.f32 %v540_v16, %v415_v4  ;;  %v567_v42 = vadd.f32 %v566_v17, %v441_v5 }
  0xca   : > { %v592_v18 = vpop.f32.mrf.mxu2  ;;  %v2790_v19 = vpop.f32.mrf.mxu3 }
  0xcb   : > { %v672_v20 = vpop.f32.mrf.mxu0  ;;  %v698_v21 = vpop.f32.mrf.mxu1  ;;  %v593_v0 = vadd.f32 %v592_v18, %v467_v6  ;;  %v613_v6 = vadd.f32 %v2786_v11, %v2780_v63  ;;  %v619_v17 = vadd.f32 %v2790_v19, %v2784_v7  ;;  %v932_v11 = vld [vmem:[%s3405_s2 + $0x8] sm:$0xff]  ;;  %v933_v7 = vld [vmem:[%s3405_s2 + $0x10] sm:$0xff]  ;;  %v934_v19 = vld [vmem:[%s3405_s2 + $0x18] sm:$0xff] }
  0xcc   : > { %v759_v58 = vadd.f32 %v672_v20, %v535_v45  ;;  %v760_v5 = vadd.f32 %v698_v21, %v561_v60  ;;  %v1303_v60 = vld [vmem:[%s3407_s4 + $0xd0] sm:$0xff] }
  0xd2   : > { %v724_v22 = vpop.f32.mrf.mxu2  ;;  %v2792_v23 = vpop.f32.mrf.mxu3 }
  0xd3   : > { %v675_v24 = vpop.f32.mrf.mxu0  ;;  %v701_v25 = vpop.f32.mrf.mxu1  ;;  %v761_v2 = vadd.f32 %v724_v22, %v587_v56  ;;  %v762_v18 = vadd.f32 %v2792_v23, %v613_v6  ;;  %v935_v23 = vld [vmem:[%s3405_s2 + $0x20] sm:$0xff] }
  0xd4   : > { %v764_v43 = vadd.f32 %v701_v25, %v564_v39  ;;  %v763_v53 = vadd.f32 %v675_v24, %v538_v41  ;;  %v1305_v56 = vld [vmem:[%s3407_s4 + $0xe0] sm:$0xff] }
  0xda   : > { %v727_v26 = vpop.f32.mrf.mxu2  ;;  %v753_v27 = vpop.f32.mrf.mxu3 }
  0xdb   : > { %v678_v28 = vpop.f32.mrf.mxu0  ;;  %v704_v29 = vpop.f32.mrf.mxu1  ;;  %v765_v44 = vadd.f32 %v727_v26, %v590_v40  ;;  %v766_v16 = vadd.f32 %v753_v27, %v616_v61  ;;  %v1293_v61 = vld [vmem:[%s3407_s4 + $0x80] sm:$0xff] }
  0xdc   : > { %v767_v46 = vadd.f32 %v678_v28, %v541_v38  ;;  %v768_v47 = vadd.f32 %v704_v29, %v567_v42  ;;  %v2168_v38 = vld [vmem:[%s3405_s2 + $0x28] sm:$0xff] }
  0xe2   : > { %v730_v30 = vpop.f32.mrf.mxu2  ;;  %v2794_v31 = vpop.f32.mrf.mxu3 }
  0xe3   : > { %v822_v32 = vpop.f32.mrf.mxu0  ;;  %v848_v33 = vpop.f32.mrf.mxu1  ;;  %v769_v8 = vadd.f32 %v730_v30, %v593_v0  ;;  %v770_v20 = vadd.f32 %v2794_v31, %v619_v17  ;;  %v1304_v0 = vld [vmem:[%s3407_s4 + $0xd8] sm:$0xff]  ;;  %v1291_v17 = vld [vmem:[%s3407_s4 + $0x70] sm:$0xff] }
  0xe4   : > { %v909_v4 = vadd.f32 %v822_v32, %v759_v58  ;;  %v910_v13 = vadd.f32 %v848_v33, %v760_v5  ;;  %v2172_v58 = vld [vmem:[%s3405_s2 + $0x48] sm:$0xff]  ;;  %v1299_v5 = vld [vmem:[%s3407_s4 + $0xb0] sm:$0xff] }
  0xea   : > { %v874_v34 = vpop.f32.mrf.mxu2  ;;  %v900_v37 = vpop.f32.mrf.mxu3 }
  0xeb   : > { %v825_v35 = vpop.f32.mrf.mxu0  ;;  %v851_v36 = vpop.f32.mrf.mxu1  ;;  %v911_v62 = vadd.f32 %v874_v34, %v761_v2  ;;  %v912_v63 = vadd.f32 %v900_v37, %v762_v18  ;;  %v1301_v2 = vld [vmem:[%s3407_s4 + $0xc0] sm:$0xff]  ;;  %v1292_v18 = vld [vmem:[%s3407_s4 + $0x78] sm:$0xff] }
  0xec   : > { %v914_v49 = vadd.f32 %v851_v36, %v764_v43  ;;  %v913_v59 = vadd.f32 %v825_v35, %v763_v53  ;;  %v2187_v53 = vld [vmem:[%s3405_s2 + $0x60] sm:$0xff] }
  0xed   : > { %v2326_v9 = vpack.i.bf16 %v911_v62, %v910_v13  ;;  %v2336_v24 = vpack.i.bf16 %v912_v63, %v911_v62  ;;  %v2189_v62 = vld [vmem:[%s3405_s2 + $0x70] sm:$0xff]  ;;  %v1288_v63 = vld [vmem:[%s3407_s4 + $0x58] sm:$0xff] }
  0xf2   : > { %v877_v48 = vpop.f32.mrf.mxu2  ;;  %v903_v1 = vpop.f32.mrf.mxu3 }
  0xf3   : > { %v915_v50 = vadd.f32 %v877_v48, %v765_v44  ;;  %v828_v51 = vpop.f32.mrf.mxu0  ;;  %v854_v52 = vpop.f32.mrf.mxu1  ;;  %v916_v3 = vadd.f32 %v903_v1, %v766_v16  ;;  %v2185_v48 = vld [vmem:[%s3405_s2 + $0x50] sm:$0xff] }
  0xf4   : > { %v917_v54 = vadd.f32 %v828_v51, %v767_v46  ;;  %v918_v55 = vadd.f32 %v854_v52, %v768_v47  ;;  %v2169_v47 = vld [vmem:[%s3405_s2 + $0x30] sm:$0xff]  ;;  %v2186_v51 = vld [vmem:[%s3405_s2 + $0x58] sm:$0xff]  ;;  %v2171_v52 = vld [vmem:[%s3405_s2 + $0x40] sm:$0xff] }
  0xf5   : > { %v2321_v57 = vpack.i.bf16 %v915_v50, %v914_v49  ;;  %v2331_v22 = vpack.i.bf16 %v916_v3, %v915_v50  ;;  %v2170_v50 = vld [vmem:[%s3405_s2 + $0x38] sm:$0xff]  ;;  %v1315_v16 = vld [vmem:[%s3407_s4 + $0x130] sm:$0xff]  ;;  %v1289_v3 = vld [vmem:[%s3407_s4 + $0x60] sm:$0xff] }
  0xf6   : > { %1050 = vrot.lane.b32.xlu0 %v918_v55, %s2444_s15  ;;  %2156 = vmatpush.msk.msra.mxu1 %vm379_vm0, %v917_v54  ;;  %v1307_v54 = vld [vmem:[%s3407_s4 + $0xf0] sm:$0xff] }
  0xf7   : > { %2322 = vrot.lane.b32.xlu1 %v2321_v57, %s2444_s15  ;;  %v1306_v57 = vld [vmem:[%s3407_s4 + $0xe8] sm:$0xff] }
  0xf8   : > { %971 = vmatpush.msra.mxu1 %v913_v59  ;;  %v2188_v59 = vld [vmem:[%s3405_s2 + $0x68] sm:$0xff] }
  0xfa   : > { %v880_v12 = vpop.f32.mrf.mxu2  ;;  %972 = vmatpush.msra.mxu1 %v909_v4  ;;  %v906_v15 = vpop.f32.mrf.mxu3  ;;  %v1302_v4 = vld [vmem:[%s3407_s4 + $0xc8] sm:$0xff] }
  0xfb   : > { %v919_v14 = vadd.f32 %v880_v12, %v769_v8  ;;  %2157 = vmatmul.msk.f32.vlgmr.msra.gmra.mxu1 %vm369_vm1, %v931_v10  ;;  %v920_v21 = vadd.f32 %v906_v15, %v770_v20  ;;  %v1300_v8 = vld [vmem:[%s3407_s4 + $0xb8] sm:$0xff]  ;;  %v1298_v12 = vld [vmem:[%s3407_s4 + $0xa8] sm:$0xff]  ;;  %v1287_v20 = vld [vmem:[%s3407_s4 + $0x50] sm:$0xff] }
  0xfc   : > { %2162 = vmatpush.msk.msrb.mxu1 %vm379_vm0, %v918_v55  ;;  %v1308_v55 = vld [vmem:[%s3407_s4 + $0xf8] sm:$0xff]  ;;  %v1290_v15 = vld [vmem:[%s3407_s4 + $0x68] sm:$0xff] }
  0xfd   : > { %1172 = vrot.lane.b32.xlu2 %v919_v14, %s2445_s26 }
  0xfe   : > { %1003 = vmatpush.msrb.mxu1 %v914_v49  ;;  %1052 = vrot.lane.b32.xlu0 %v919_v14, %s2444_s15  ;;  %v1296_v14 = vld [vmem:[%s3407_s4 + $0x98] sm:$0xff] }
  0xff   : > { %2327 = vrot.lane.b32.xlu1 %v2326_v9, %s2444_s15  ;;  %v1294_v9 = vld [vmem:[%s3407_s4 + $0x88] sm:$0xff] }
 0x100   : > { %1004 = vmatpush.msrb.mxu1 %v910_v13  ;;  %v1295_v13 = vld [vmem:[%s3407_s4 + $0x90] sm:$0xff] }
 0x103   : > { %2158 = vmatmul.msk.f32.gmra.mxu1 %vm369_vm1, %v932_v11 }
 0x105   : > { %1174 = vrot.lane.b32.xlu2 %v920_v21, %s2445_s26  ;;  %v1285_v21 = vld [vmem:[%s3407_s4 + $0x40] sm:$0xff] }
 0x106   : > { %2332 = vrot.lane.b32.xlu0 %v2331_v22, %s2445_s26  ;;  %v1286_v22 = vld [vmem:[%s3407_s4 + $0x48] sm:$0xff] }
 0x107   : > { %2337 = vrot.lane.b32.xlu1 %v2336_v24, %s2445_s26  ;;  %v1283_v24 = vld [vmem:[%s3407_s4 + $0x30] sm:$0xff]  ;;  %s324_s26 = sand.u32 1, %s2434_s12  }
 0x10b   : > { %2159 = vmatmul.msk.f32.gmra.mxu1 %vm369_vm1, %v933_v7 }
 0x113   : > { %2160 = vmatmul.msk.f32.gmra.mxu1 %vm369_vm1, %v934_v19 }
 0x11b   : > { %2161 = vmatmul.msk.f32.gmra.mxu1 %vm369_vm1, %v935_v23 }
 0x123   : > { %2163 = vmatmul.msk.f32.vlgmr.msrb.gmra.mxu1 %vm369_vm1, %v931_v10  ;;  %v1297_v10 = vld [vmem:[%s3407_s4 + $0xa0] sm:$0xff] }
 0x12b   : > { %2164 = vmatmul.msk.f32.gmra.mxu1 %vm369_vm1, %v932_v11  ;;  %v1316_v11 = vld [vmem:[%s3407_s4 + $0x138] sm:$0xff] }
 0x133   : > { %2165 = vmatmul.msk.f32.gmra.mxu1 %vm369_vm1, %v933_v7 }
 0x13b   : > { %2166 = vmatmul.msk.f32.gmra.mxu1 %vm369_vm1, %v934_v19  ;;  %v1284_v19 = vld [vmem:[%s3407_s4 + $0x38] sm:$0xff] }
 0x143   : > { %2167 = vmatmul.msk.f32.gmra.mxu1 %vm369_vm1, %v935_v23 }
 0x157   : > { %v1173_v25 = vpop.permute.xlu2 %1172 }
 0x15f   : > { %v1175_v26 = vpop.permute.xlu2 %1174 }
 0x160   : > { %v1179_v27 = vsel %vm1176_vm2, %v1173_v25, %v1175_v26  ;;  %2196 = vmatpush.msk.msra.mxu1 %vm379_vm0, %v1175_v26 }
 0x161   : > { %2190 = vmatpush.msk.msra.mxu0 %vm379_vm0, %v1179_v27 }
 0x168   : > { %v1051_v28 = vpop.permute.xlu0 %1050 }
 0x169   : > { %v2323_v29 = vpop.permute.xlu1 %2322 }
 0x16a   : > { %v2325_v30 = vunpack.i.h.bf16 %v2323_v29  ;;  %v2324_v31 = vunpack.i.l.bf16 %v2323_v29  ;;  %v1314_v29 = vld [vmem:[%s3407_s4 + $0x128] sm:$0xff] }
 0x16c   : > { %v1056_v37 = vsel %vm1054_vm3, %v2324_v31, %v2325_v30  ;;  %v1282_v31 = vld [vmem:[%s3407_s4 + $0x28] sm:$0xff] }
 0x170   : > { %v1053_v32 = vpop.permute.xlu0 %1052 }
 0x171   : > { %v1057_v33 = vsel %vm1054_vm3, %v1051_v28, %v1053_v32  ;;  %v2328_v34 = vpop.permute.xlu1 %2327  ;;  %2179 = vmatpush.msk.msra.mxu3 %vm379_vm0, %v1053_v32  ;;  %v1313_v28 = vld [vmem:[%s3407_s4 + $0x120] sm:$0xff]  ;;  %v1311_v32 = vld [vmem:[%s3407_s4 + $0x110] sm:$0xff] }
 0x172   : > { %v2330_v35 = vunpack.i.h.bf16 %v2328_v34  ;;  %v2329_v36 = vunpack.i.l.bf16 %v2328_v34  ;;  %2173 = vmatpush.msk.msra.mxu2 %vm379_vm0, %v1057_v33  ;;  %v1312_v33 = vld [vmem:[%s3407_s4 + $0x118] sm:$0xff]  ;;  %v1279_v34 = vld [vmem:[%s3407_s4 + $0x10] sm:$0xff] }
 0x173   : > { %1127 = vmatpush.msra.mxu3 %v2325_v30  ;;  %v1281_v30 = vld [vmem:[%s3407_s4 + $0x20] sm:$0xff] }
 0x174   : > { %1095 = vmatpush.msra.mxu2 %v1056_v37  ;;  %v1055_v39 = vsel %vm1054_vm3, %v2329_v36, %v2330_v35  ;;  %v1309_v36 = vld [vmem:[%s3407_s4 + $0x100] sm:$0xff]  ;;  %v1310_v37 = vld [vmem:[%s3407_s4 + $0x108] sm:$0xff] }
 0x175   : > { %1128 = vmatpush.msra.mxu3 %v2330_v35  ;;  %v1280_v35 = vld [vmem:[%s3407_s4 + $0x18] sm:$0xff] }
 0x176   : > { %1096 = vmatpush.msra.mxu2 %v1055_v39  ;;  %2180 = vmatmul.msk.f32.vlgmr.msra.gmra.mxu3 %vm369_vm1, %v2168_v38  ;;  %v1277_v39 = vld [vmem:[%s3407_s4] sm:$0xff] }
 0x177   : > { %2174 = vmatmul.msk.f32.vlgmr.msra.gmra.mxu2 %vm369_vm1, %v2168_v38  ;;  %1377 = vmatpush.msrb.mxu3 %v1315_v16 }
 0x178   : > { %v2333_v40 = vpop.permute.xlu0 %2332  ;;  %1333 = vmatpush.msrb.mxu2 %v1307_v54  ;;  %v2900_v1 = vpop.f32.mrf.mxu1 }
 0x179   : > { %v2335_v41 = vunpack.i.h.bf16 %v2333_v40  ;;  %v2334_v42 = vunpack.i.l.bf16 %v2333_v40  ;;  %v2338_v43 = vpop.permute.xlu1 %2337  ;;  %1378 = vmatpush.msrb.mxu3 %v1313_v28  ;;  %v1278_v40 = vld [vmem:[%s3407_s4 + $0x8] sm:$0xff] }
 0x17a   : > { %v2340_v44 = vunpack.i.h.bf16 %v2338_v43  ;;  %v2339_v45 = vunpack.i.l.bf16 %v2338_v43  ;;  %1334 = vmatpush.msrb.mxu2 %v1305_v56  ;;  %v922_v43 = vld [vmem:[%s3406_s3 + $0x8] sm:$0xff] }
 0x17b   : > { %1249 = vmatpush.msra.mxu1 %v2335_v41  ;;  %v1178_v46 = vsel %vm1176_vm2, %v2334_v42, %v2335_v41  ;;  %1379 = vmatpush.msrb.mxu3 %v1311_v32 }
 0x17c   : > { %1217 = vmatpush.msra.mxu0 %v1178_v46  ;;  %v1177_v49 = vsel %vm1176_vm2, %v2339_v45, %v2340_v44  ;;  %1335 = vmatpush.msrb.mxu2 %v1303_v60 }
 0x17d   : > { %1250 = vmatpush.msra.mxu1 %v2340_v44  ;;  %1380 = vmatpush.msrb.mxu3 %v1309_v36  ;;  %v921_v44 = vld [vmem:[%s3406_s3] sm:$0xff] }
 0x17e   : > { %2181 = vmatmul.msk.f32.gmra.mxu3 %vm369_vm1, %v2169_v47  ;;  %1218 = vmatpush.msra.mxu0 %v1177_v49  ;;  %v1021_v46 = vadd.f32 %v2900_v1, %v921_v44 }
 0x17f   : > { %2197 = vmatmul.msk.f32.vlgmr.msra.gmra.mxu1 %vm369_vm1, %v2185_v48  ;;  %2175 = vmatmul.msk.f32.gmra.mxu2 %vm369_vm1, %v2169_v47 }
 0x180   : > { %2191 = vmatmul.msk.f32.vlgmr.msra.gmra.mxu0 %vm369_vm1, %v2185_v48  ;;  %1336 = vmatpush.msrb.mxu2 %v1301_v2  ;;  %v2940_v6 = vpop.f32.mrf.mxu1 }
 0x181   : > { %1397 = vmatpush.msrb.mxu0 %v1308_v55  ;;  %1441 = vmatpush.msrb.mxu1 %v1316_v11  ;;  %v923_v55 = vld [vmem:[%s3406_s3 + $0x10] sm:$0xff] }
 0x182   : > { %1337 = vmatpush.msrb.mxu2 %v1299_v5 }
 0x183   : > { %1398 = vmatpush.msrb.mxu0 %v1306_v57  ;;  %1442 = vmatpush.msrb.mxu1 %v1314_v29  ;;  %v929_v29 = vld [vmem:[%s3406_s3 + $0x40] sm:$0xff] }
 0x184   : > { %1338 = vmatpush.msrb.mxu2 %v1297_v10 }
 0x185   : > { %1399 = vmatpush.msrb.mxu0 %v1304_v0  ;;  %1443 = vmatpush.msrb.mxu1 %v1312_v33 }
 0x186   : > { %2182 = vmatmul.msk.f32.gmra.mxu3 %vm369_vm1, %v2170_v50  ;;  %1339 = vmatpush.msrb.mxu2 %v1295_v13 }
 0x187   : > { %2198 = vmatmul.msk.f32.gmra.mxu1 %vm369_vm1, %v2186_v51  ;;  %2176 = vmatmul.msk.f32.gmra.mxu2 %vm369_vm1, %v2170_v50 }
 0x188   : > { %2192 = vmatmul.msk.f32.gmra.mxu0 %vm369_vm1, %v2186_v51  ;;  %1340 = vmatpush.msrb.mxu2 %v1293_v61  ;;  %v2978_v7 = vpop.f32.mrf.mxu1 }
 0x189   : > { %1400 = vmatpush.msrb.mxu0 %v1302_v4  ;;  %1444 = vmatpush.msrb.mxu1 %v1310_v37  ;;  %v926_v4 = vld [vmem:[%s3406_s3 + $0x28] sm:$0xff] }
 0x18a   : > { %1341 = vmatpush.msrb.mxu2 %v1291_v17  ;;  %v928_v17 = vld [vmem:[%s3406_s3 + $0x38] sm:$0xff] }
 0x18b   : > { %1401 = vmatpush.msrb.mxu0 %v1300_v8 }
 0x18c   : > { %1342 = vmatpush.msrb.mxu2 %v1289_v3 }
 0x18d   : > { %1402 = vmatpush.msrb.mxu0 %v1298_v12 }
 0x18e   : > { %2183 = vmatmul.msk.f32.gmra.mxu3 %vm369_vm1, %v2171_v52  ;;  %1343 = vmatpush.msrb.mxu2 %v1287_v20 }
 0x18f   : > { %2199 = vmatmul.msk.f32.gmra.mxu1 %vm369_vm1, %v2187_v53  ;;  %2177 = vmatmul.msk.f32.gmra.mxu2 %vm369_vm1, %v2171_v52  ;;  %v924_v52 = vld [vmem:[%s3406_s3 + $0x18] sm:$0xff] }
 0x190   : > { %2193 = vmatmul.msk.f32.gmra.mxu0 %vm369_vm1, %v2187_v53  ;;  %1344 = vmatpush.msrb.mxu2 %v1285_v21  ;;  %v2983_v23 = vpop.f32.mrf.mxu1 }
 0x191   : > { %1403 = vmatpush.msrb.mxu0 %v1296_v14 }
 0x192   : > { %1345 = vmatpush.msrb.mxu2 %v1283_v24 }
 0x193   : > { %1404 = vmatpush.msrb.mxu0 %v1294_v9 }
 0x194   : > { %1346 = vmatpush.msrb.mxu2 %v1281_v30 }
 0x195   : > { %1405 = vmatpush.msrb.mxu0 %v1292_v18 }
 0x196   : > { %2184 = vmatmul.msk.f32.gmra.mxu3 %vm369_vm1, %v2172_v58  ;;  %1347 = vmatpush.msrb.mxu2 %v1279_v34 }
 0x197   : > { %2200 = vmatmul.msk.f32.gmra.mxu1 %vm369_vm1, %v2188_v59  ;;  %2178 = vmatmul.msk.f32.gmra.mxu2 %vm369_vm1, %v2172_v58  ;;  %v1023_v58 = vadd.f32 %v2940_v6, %v923_v55 }
 0x198   : > { %2194 = vmatmul.msk.f32.gmra.mxu0 %vm369_vm1, %v2188_v59  ;;  %v2985_v25 = vpop.f32.mrf.mxu1  ;;  %1348 = vmatpush.msrb.mxu2 %v1277_v39 }
 0x199   : > { %1406 = vmatpush.msrb.mxu0 %v1290_v15  ;;  %v927_v15 = vld [vmem:[%s3406_s3 + $0x30] sm:$0xff] }
 0x19a   : > { %v1027_v11 = vadd.f32 %v2983_v23, %v927_v15 }
 0x19b   : > { %1407 = vmatpush.msrb.mxu0 %v1288_v63 }
 0x19d   : > { %1408 = vmatpush.msrb.mxu0 %v1286_v22 }
 0x19f   : > { %2201 = vmatmul.msk.f32.gmra.mxu1 %vm369_vm1, %v2189_v62  ;;  %1409 = vmatpush.msrb.mxu0 %v1284_v19 }
 0x1a0   : > { %2195 = vmatmul.msk.f32.gmra.mxu0 %vm369_vm1, %v2189_v62  ;;  %v1006_v26 = vpop.f32.mrf.mxu1  ;;  %v925_v62 = vld [vmem:[%s3406_s3 + $0x20] sm:$0xff] }
 0x1a1   : > { %1410 = vmatpush.msrb.mxu0 %v1282_v31  ;;  %v1022_v45 = vadd.f32 %v1006_v26, %v922_v43  ;;  %v1025_v13 = vadd.f32 %v2978_v7, %v925_v62  ;;  %v930_v26 = vld [vmem:[%s3406_s3 + $0x48] sm:$0xff]  ;;  %v1029_v31 = vadd.f32 %v2985_v25, %v929_v29 }
 0x1a3   : > { %1411 = vmatpush.msrb.mxu0 %v1280_v35 }
 0x1a5   : > { %1412 = vmatpush.msrb.mxu0 %v1278_v40 }
 0x1a8   : > { %v1009_v27 = vpop.f32.mrf.mxu1 }
 0x1a9   : > { %v1024_v57 = vadd.f32 %v1009_v27, %v924_v52 }
 0x1b0   : > { %v1012_v38 = vpop.f32.mrf.mxu1 }
 0x1b1   : > { %v1026_v12 = vadd.f32 %v1012_v38, %v926_v4 }
 0x1b8   : > { %v1015_v41 = vpop.f32.mrf.mxu1 }
 0x1b9   : > { %v1028_v63 = vadd.f32 %v1015_v41, %v928_v17  ;;  %v1461_v17 = vld [vmem:[%s3408_s5] sm:$0xff] }
 0x1c0   : > { %v3023_v42 = vpop.f32.mrf.mxu1 }
 0x1c1   : > { %v1030_v23 = vadd.f32 %v3023_v42, %v930_v26 }
 0x1f9   : > { %v1130_v47 = vpop.f32.mrf.mxu3 }
 0x1fa   : > { %v1146_v48 = vadd.f32 %v1130_v47, %v1022_v45  ;;  %v1098_v49 = vpop.f32.mrf.mxu2 }
 0x1fb   : > { %v1145_v50 = vadd.f32 %v1098_v49, %v1021_v46 }
 0x1fc   : > { %v1252_v51 = vpop.f32.mrf.mxu1 }
 0x1fd   : > { %v1268_v53 = vadd.f32 %v1252_v51, %v1146_v48  ;;  %v1220_v54 = vpop.f32.mrf.mxu0 }
 0x1fe   : > { %v1267_v56 = vadd.f32 %v1220_v54, %v1145_v50 }
 0x1ff   : > { %2202 = vmatmul.msk.f32.vlgmr.msrb.gmra.mxu3 %vm1317_vm4, %v1268_v53  ;;  %2207 = vmatmul.msk.f32.vlgmr.msrb.gmra.mxu1 %vm1317_vm4, %v1268_v53 }
 0x200   : > { %1349 = vmatmul.f32.vlgmr.msrb.gmra.mxu2 %v1267_v56  ;;  %1413 = vmatmul.f32.vlgmr.msrb.gmra.mxu0 %v1267_v56 }
 0x201   : > { %v1133_v59 = vpop.f32.mrf.mxu3 }
 0x202   : > { %v1148_v1 = vadd.f32 %v1133_v59, %v1024_v57  ;;  %v1101_v60 = vpop.f32.mrf.mxu2 }
 0x203   : > { %v1147_v0 = vadd.f32 %v1101_v60, %v1023_v58 }
 0x204   : > { %v1255_v2 = vpop.f32.mrf.mxu1 }
 0x205   : > { %v1270_v5 = vadd.f32 %v1255_v2, %v1148_v1  ;;  %v1223_v8 = vpop.f32.mrf.mxu0 }
 0x206   : > { %v1269_v10 = vadd.f32 %v1223_v8, %v1147_v0 }
 0x207   : > { %2203 = vmatmul.msk.f32.gmra.mxu3 %vm1317_vm4, %v1270_v5  ;;  %2208 = vmatmul.msk.f32.gmra.mxu1 %vm1317_vm4, %v1270_v5 }
 0x208   : > { %1352 = vmatmul.f32.gmra.mxu2 %v1269_v10  ;;  %1416 = vmatmul.f32.gmra.mxu0 %v1269_v10 }
 0x209   : > { %v1136_v14 = vpop.f32.mrf.mxu3 }
 0x20a   : > { %v1150_v61 = vadd.f32 %v1136_v14, %v1026_v12  ;;  %v1104_v6 = vpop.f32.mrf.mxu2 }
 0x20b   : > { %v1149_v9 = vadd.f32 %v1104_v6, %v1025_v13 }
 0x20c   : > { %v1258_v16 = vpop.f32.mrf.mxu1 }
 0x20d   : > { %v1272_v18 = vadd.f32 %v1258_v16, %v1150_v61  ;;  %v1226_v3 = vpop.f32.mrf.mxu0 }
 0x20e   : > { %v1271_v20 = vadd.f32 %v1226_v3, %v1149_v9 }
 0x20f   : > { %2204 = vmatmul.msk.f32.gmra.mxu3 %vm1317_vm4, %v1272_v18  ;;  %2209 = vmatmul.msk.f32.gmra.mxu1 %vm1317_vm4, %v1272_v18 }
 0x210   : > { %1355 = vmatmul.f32.gmra.mxu2 %v1271_v20  ;;  %1419 = vmatmul.f32.gmra.mxu0 %v1271_v20 }
 0x211   : > { %v1139_v21 = vpop.f32.mrf.mxu3 }
 0x212   : > { %v1152_v22 = vadd.f32 %v1139_v21, %v1028_v63  ;;  %v1107_v24 = vpop.f32.mrf.mxu2  ;;  %v1462_v63 = vld [vmem:[%s3408_s5 + $0x8] sm:$0xff] }
 0x213   : > { %v1151_v7 = vadd.f32 %v1107_v24, %v1027_v11 }
 0x214   : > { %v1261_v19 = vpop.f32.mrf.mxu1 }
 0x215   : > { %v1274_v27 = vadd.f32 %v1261_v19, %v1152_v22  ;;  %v1229_v28 = vpop.f32.mrf.mxu0  ;;  %v1463_v22 = vld [vmem:[%s3408_s5 + $0x10] sm:$0xff] }
 0x216   : > { %v1273_v30 = vadd.f32 %v1229_v28, %v1151_v7 }
 0x217   : > { %2205 = vmatmul.msk.f32.gmra.mxu3 %vm1317_vm4, %v1274_v27  ;;  %2210 = vmatmul.msk.f32.gmra.mxu1 %vm1317_vm4, %v1274_v27 }
 0x218   : > { %1358 = vmatmul.f32.gmra.mxu2 %v1273_v30  ;;  %1422 = vmatmul.f32.gmra.mxu0 %v1273_v30 }
 0x219   : > { %v1142_v32 = vpop.f32.mrf.mxu3 }
 0x21a   : > { %v1154_v33 = vadd.f32 %v1142_v32, %v1030_v23  ;;  %v1110_v34 = vpop.f32.mrf.mxu2 }
 0x21b   : > { %v1153_v35 = vadd.f32 %v1110_v34, %v1029_v31 }
 0x21c   : > { %v1264_v36 = vpop.f32.mrf.mxu1 }
 0x21d   : > { %v1276_v37 = vadd.f32 %v1264_v36, %v1154_v33  ;;  %v1232_v38 = vpop.f32.mrf.mxu0 }
 0x21e   : > { %v1275_v39 = vadd.f32 %v1232_v38, %v1153_v35  ;;  %v1464_v35 = vld [vmem:[%s3408_s5 + $0x18] sm:$0xff] }
 0x21f   : > { %2206 = vmatmul.msk.f32.gmra.mxu3 %vm1317_vm4, %v1276_v37  ;;  %2211 = vmatmul.msk.f32.gmra.mxu1 %vm1317_vm4, %v1276_v37 }
 0x220   : > { %1361 = vmatmul.f32.gmra.mxu2 %v1275_v39  ;;  %1425 = vmatmul.f32.gmra.mxu0 %v1275_v39 }
 0x27c   : > { %v1446_v40 = vpop.f32.mrf.mxu1 }
 0x27d   : > { %v1414_v41 = vpop.f32.mrf.mxu0 }
 0x27e   : > { %v1447_v10 = vadd.f32 %v1446_v40, %v1414_v41 }
 0x282   : > { %v1382_v42 = vpop.f32.mrf.mxu3 }
 0x283   : > { %v1350_v43 = vpop.f32.mrf.mxu2 }
 0x284   : > { %v1449_v44 = vpop.f32.mrf.mxu1  ;;  %v1383_v5 = vadd.f32 %v1382_v42, %v1350_v43  ;;  %v2212_v42 = vld [vmem:[%s3408_s5 + $0x50] sm:$0xff] }
 0x285   : > { %v1417_v25 = vpop.f32.mrf.mxu0 }
 0x286   : > { %v2361_v13 = vpack.i.bf16 %v1447_v10, %v1383_v5  ;;  %v1450_v6 = vadd.f32 %v1449_v44, %v1417_v25  ;;  %v1465_v44 = vld [vmem:[%s3408_s5 + $0x20] sm:$0xff] }
 0x287   : > { %v2242_v25 = vld [vmem:[%s3408_s5 + $0xa0] sm:$0xff] }
 0x28a   : > { %v1385_v45 = vpop.f32.mrf.mxu3 }
 0x28b   : > { %v1353_v46 = vpop.f32.mrf.mxu2 }
 0x28c   : > { %v1452_v47 = vpop.f32.mrf.mxu1  ;;  %v1386_v61 = vadd.f32 %v1385_v45, %v1353_v46  ;;  %v2213_v46 = vld [vmem:[%s3408_s5 + $0x58] sm:$0xff] }
 0x28d   : > { %v1420_v48 = vpop.f32.mrf.mxu0 }
 0x28e   : > { %v1453_v51 = vadd.f32 %v1452_v47, %v1420_v48  ;;  %v2356_v9 = vpack.i.bf16 %v1450_v6, %v1386_v61  ;;  %v1466_v47 = vld [vmem:[%s3408_s5 + $0x28] sm:$0xff] }
 0x28f   : > { %v2243_v48 = vld [vmem:[%s3408_s5 + $0xa8] sm:$0xff] }
 0x290   : > { %v2371_v16 = vpack.i.bf16 %v1450_v6, %v1453_v51 }
 0x292   : > { %v1388_v49 = vpop.f32.mrf.mxu3 }
 0x293   : > { %v1356_v50 = vpop.f32.mrf.mxu2 }
 0x294   : > { %v1389_v52 = vadd.f32 %v1388_v49, %v1356_v50  ;;  %v1455_v53 = vpop.f32.mrf.mxu1  ;;  %v2214_v49 = vld [vmem:[%s3408_s5 + $0x60] sm:$0xff]  ;;  %v1467_v50 = vld [vmem:[%s3408_s5 + $0x30] sm:$0xff] }
 0x295   : > { %v1423_v54 = vpop.f32.mrf.mxu0 }
 0x296   : > { %v2341_v55 = vpack.i.bf16 %v1453_v51, %v1389_v52  ;;  %v1456_v58 = vadd.f32 %v1455_v53, %v1423_v54  ;;  %v2244_v51 = vld [vmem:[%s3408_s5 + $0xb0] sm:$0xff]  ;;  %v1468_v53 = vld [vmem:[%s3408_s5 + $0x38] sm:$0xff] }
 0x297   : > { %v2245_v54 = vld [vmem:[%s3408_s5 + $0xb8] sm:$0xff] }
 0x298   : > { %2342 = vrot.lane.b32.xlu1 %v2341_v55, %s2446_s23  ;;  %v2216_v55 = vld [vmem:[%s3408_s5 + $0x70] sm:$0xff] }
 0x29a   : > { %v1391_v56 = vpop.f32.mrf.mxu3 }
 0x29b   : > { %v1359_v57 = vpop.f32.mrf.mxu2 }
 0x29c   : > { %v1392_v59 = vadd.f32 %v1391_v56, %v1359_v57  ;;  %v1458_v1 = vpop.f32.mrf.mxu1  ;;  %v1469_v56 = vld [vmem:[%s3408_s5 + $0x40] sm:$0xff] }
 0x29d   : > { %v1426_v60 = vpop.f32.mrf.mxu0  ;;  %v2246_v57 = vld [vmem:[%s3408_s5 + $0xc0] sm:$0xff] }
 0x29e   : > { %v2346_v0 = vpack.i.bf16 %v1456_v58, %v1392_v59  ;;  %v1459_v2 = vadd.f32 %v1458_v1, %v1426_v60  ;;  %v2247_v1 = vld [vmem:[%s3408_s5 + $0xc8] sm:$0xff]  ;;  %v2218_v60 = vld [vmem:[%s3408_s5 + $0x80] sm:$0xff] }
 0x2a0   : > { %v2366_v4 = vpack.i.bf16 %v1456_v58, %v1459_v2  ;;  %2347 = vrot.lane.b32.xlu0 %v2346_v0, %s2446_s23  ;;  %v2217_v58 = vld [vmem:[%s3408_s5 + $0x78] sm:$0xff]  ;;  %v2248_v0 = vld [vmem:[%s3408_s5 + $0xd0] sm:$0xff] }
 0x2a2   : > { %2367 = vrot.lane.b32.xlu1 %v2366_v4, %s2444_s15  ;;  %v1394_v8 = vpop.f32.mrf.mxu3  ;;  %v2249_v4 = vld [vmem:[%s3408_s5 + $0xd8] sm:$0xff] }
 0x2a3   : > { %v1362_v62 = vpop.f32.mrf.mxu2 }
 0x2a4   : > { %v1395_v12 = vadd.f32 %v1394_v8, %v1362_v62  ;;  %v2250_v8 = vld [vmem:[%s3408_s5 + $0xe0] sm:$0xff]  ;;  %v2221_v62 = vld [vmem:[%s3408_s5 + $0x98] sm:$0xff] }
 0x2a6   : > { %v2351_v14 = vpack.i.bf16 %v1459_v2, %v1395_v12  ;;  %1642 = vmatpush.msra.mxu3 %v1395_v12  ;;  %v2219_v2 = vld [vmem:[%s3408_s5 + $0x88] sm:$0xff] }
 0x2a8   : > { %2362 = vrot.lane.b32.xlu0 %v2361_v13, %s2446_s23  ;;  %2352 = vrot.lane.b32.xlu2 %v2351_v14, %s2446_s23 }
 0x2a9   : > { %1643 = vmatpush.msra.mxu3 %v1392_v59  ;;  %v1470_v59 = vld [vmem:[%s3408_s5 + $0x48] sm:$0xff] }
 0x2ab   : > { %1644 = vmatpush.msra.mxu3 %v1389_v52  ;;  %v2215_v52 = vld [vmem:[%s3408_s5 + $0x68] sm:$0xff] }
 0x2ad   : > { %1645 = vmatpush.msra.mxu3 %v1386_v61 }
 0x2af   : > { %1646 = vmatpush.msra.mxu3 %v1383_v5  ;;  %v2220_v5 = vld [vmem:[%s3408_s5 + $0x90] sm:$0xff] }
 0x2b0   : > { %1689 = vrot.lane.b32.xlu0 %v1447_v10, %s2444_s15  ;;  %2357 = vrot.lane.b32.xlu2 %v2356_v9, %s2446_s23  ;;  %v2251_v10 = vld [vmem:[%s3408_s5 + $0xe8] sm:$0xff] }
 0x2b1   : > { %2232 = vmatmul.msk.f32.vlgmr.msra.gmra.mxu3 %vm1523_vm5, %v1461_v17 }
 0x2b8   : > { %2372 = vrot.lane.b32.xlu2 %v2371_v16, %s2444_s15  ;;  %s1974_s15 = scalar_lea.sflag [#allocation4], %s324_s26 }
 0x2b9   : > { %2233 = vmatmul.msk.f32.gmra.mxu3 %vm1523_vm5, %v1462_v63 }
 0x2c1   : > { %2234 = vmatmul.msk.f32.gmra.mxu3 %vm1523_vm5, %v1463_v22 }
 0x2c9   : > { %2235 = vmatmul.msk.f32.gmra.mxu3 %vm1523_vm5, %v1464_v35 }
 0x2d1   : > { %2236 = vmatmul.msk.f32.gmra.mxu3 %vm1523_vm5, %v1465_v44 }
 0x2d9   : > { %2237 = vmatmul.msk.f32.gmra.mxu3 %vm1523_vm5, %v1466_v47 }
 0x2e1   : > { %2238 = vmatmul.msk.f32.gmra.mxu3 %vm1523_vm5, %v1467_v50 }
 0x2e9   : > { %2239 = vmatmul.msk.f32.gmra.mxu3 %vm1523_vm5, %v1468_v53 }
 0x2f1   : > { %2240 = vmatmul.msk.f32.gmra.mxu3 %vm1523_vm5, %v1469_v56 }
 0x2f9   : > { %2241 = vmatmul.msk.f32.gmra.mxu3 %vm1523_vm5, %v1470_v59 }
 0x302   : > { %v2353_v18 = vpop.permute.xlu2 %2352 }
 0x303   : > { %v2355_v3 = vunpack.i.h.bf16 %v2353_v18  ;;  %v2354_v15 = vunpack.i.l.bf16 %v2353_v18 }
 0x305   : > { %v1517_v20 = vsel %vm1512_vm6, %v2354_v15, %v2355_v3 }
 0x306   : > { %1565 = vmatpush.msra.mxu2 %v1517_v20 }
 0x30a   : > { %v2343_v11 = vpop.permute.xlu1 %2342  ;;  %v2358_v21 = vpop.permute.xlu2 %2357 }
 0x30b   : > { %v2345_v7 = vunpack.i.h.bf16 %v2343_v11  ;;  %v2344_v19 = vunpack.i.l.bf16 %v2343_v11  ;;  %v2360_v29 = vunpack.i.h.bf16 %v2358_v21  ;;  %v2359_v30 = vunpack.i.l.bf16 %v2358_v21 }
 0x30d   : > { %v1515_v34 = vsel %vm1512_vm6, %v2344_v19, %v2345_v7  ;;  %v1514_v37 = vsel %vm1512_vm6, %v2359_v30, %v2360_v29 }
 0x312   : > { %v2348_v24 = vpop.permute.xlu0 %2347  ;;  %v2373_v32 = vpop.permute.xlu2 %2372 }
 0x313   : > { %v2350_v26 = vunpack.i.h.bf16 %v2348_v24  ;;  %v2349_v27 = vunpack.i.l.bf16 %v2348_v24  ;;  %v2374_v36 = vunpack.i.l.bf16 %v2373_v32  ;;  %v2375_v39 = vunpack.i.h.bf16 %v2373_v32 }
 0x314   : > { %v2368_v28 = vpop.permute.xlu1 %2367 }
 0x315   : > { %v2369_v23 = vunpack.i.l.bf16 %v2368_v28  ;;  %v1516_v31 = vsel %vm1512_vm6, %v2349_v27, %v2350_v26  ;;  %v2370_v33 = vunpack.i.h.bf16 %v2368_v28 }
 0x316   : > { %1566 = vmatpush.msra.mxu2 %v1516_v31 }
 0x317   : > { %1745 = vmatpush.msra.mxu0 %v2369_v23 }
 0x318   : > { %1567 = vmatpush.msra.mxu2 %v1515_v34 }
 0x319   : > { %1746 = vmatpush.msra.mxu0 %v2370_v33 }
 0x31a   : > { %v2363_v38 = vpop.permute.xlu0 %2362  ;;  %1568 = vmatpush.msra.mxu2 %v1514_v37  ;;  %v1792_v37 = vstv %s1791_s10  ;;  %s3293_s10 = smul.u32 80, %s324_s26 }
 0x31b   : > { %v2365_v40 = vunpack.i.h.bf16 %v2363_v38  ;;  %v2364_v41 = vunpack.i.l.bf16 %v2363_v38  ;;  %1747 = vmatpush.msra.mxu0 %v2374_v36 }
 0x31d   : > { %1748 = vmatpush.msra.mxu0 %v2375_v39  ;;  %v1513_v43 = vsel %vm1512_vm6, %v2364_v41, %v2365_v40 }
 0x31e   : > { %1569 = vmatpush.msra.mxu2 %v1513_v43 }
 0x31f   : > { %2222 = vmatmul.msk.f32.vlgmr.msra.gmra.mxu2 %vm1523_vm5, %v2212_v42 }
 0x322   : > { %v1690_v45 = vpop.permute.xlu0 %1689 }
 0x323   : > { %1749 = vmatpush.msra.mxu0 %v1690_v45 }
 0x324   : > { %2252 = vmatmul.msk.f32.vlgmr.msra.gmra.mxu0 %vm1523_vm5, %v2242_v25 }
 0x327   : > { %2223 = vmatmul.msk.f32.gmra.mxu2 %vm1523_vm5, %v2213_v46 }
 0x32c   : > { %2253 = vmatmul.msk.f32.gmra.mxu0 %vm1523_vm5, %v2243_v48 }
 0x32f   : > { %2224 = vmatmul.msk.f32.gmra.mxu2 %vm1523_vm5, %v2214_v49 }
 0x334   : > { %2254 = vmatmul.msk.f32.gmra.mxu0 %vm1523_vm5, %v2244_v51  ;;  %v1648_v12 = vpop.f32.mrf.mxu3 }
 0x337   : > { %2225 = vmatmul.msk.f32.gmra.mxu2 %vm1523_vm5, %v2215_v52 }
 0x33c   : > { %2255 = vmatmul.msk.f32.gmra.mxu0 %vm1523_vm5, %v2245_v54  ;;  %v1651_v13 = vpop.f32.mrf.mxu3 }
 0x33f   : > { %2226 = vmatmul.msk.f32.gmra.mxu2 %vm1523_vm5, %v2216_v55 }
 0x344   : > { %2256 = vmatmul.msk.f32.gmra.mxu0 %vm1523_vm5, %v2246_v57  ;;  %v1654_v6 = vpop.f32.mrf.mxu3 }
 0x347   : > { %2227 = vmatmul.msk.f32.gmra.mxu2 %vm1523_vm5, %v2217_v58 }
 0x34c   : > { %2257 = vmatmul.msk.f32.gmra.mxu0 %vm1523_vm5, %v2247_v1  ;;  %v1657_v17 = vpop.f32.mrf.mxu3 }
 0x34f   : > { %2228 = vmatmul.msk.f32.gmra.mxu2 %vm1523_vm5, %v2218_v60 }
 0x354   : > { %2258 = vmatmul.msk.f32.gmra.mxu0 %vm1523_vm5, %v2248_v0  ;;  %v1660_v15 = vpop.f32.mrf.mxu3 }
 0x357   : > { %2229 = vmatmul.msk.f32.gmra.mxu2 %vm1523_vm5, %v2219_v2 }
 0x35c   : > { %2259 = vmatmul.msk.f32.gmra.mxu0 %vm1523_vm5, %v2249_v4  ;;  %v1663_v11 = vpop.f32.mrf.mxu3 }
 0x35f   : > { %2230 = vmatmul.msk.f32.gmra.mxu2 %vm1523_vm5, %v2220_v5 }
 0x364   : > { %2260 = vmatmul.msk.f32.gmra.mxu0 %vm1523_vm5, %v2250_v8  ;;  %v1666_v19 = vpop.f32.mrf.mxu3 }
 0x367   : > { %2231 = vmatmul.msk.f32.gmra.mxu2 %vm1523_vm5, %v2221_v62 }
 0x36c   : > { %2261 = vmatmul.msk.f32.gmra.mxu0 %vm1523_vm5, %v2251_v10  ;;  %v1669_v29 = vpop.f32.mrf.mxu3 }
 0x374   : > { %v1672_v45 = vpop.f32.mrf.mxu3 }
 0x3a1   : > { %v1751_v14 = vpop.f32.mrf.mxu0 }
 0x3a2   : > { %v1571_v61 = vpop.f32.mrf.mxu2 }
 0x3a3   : > { %v1649_v30 = vadd.f32 %v1648_v12, %v1571_v61  ;;  %v1675_v12 = vpop.f32.mrf.mxu3 }
 0x3a5   : > { %v1781_v33 = vadd.f32 %v1751_v14, %v1649_v30 }
 0x3a7   : > { %v3206_v42 = vadd.f32 %v1792_v37, %v1781_v33 }
 0x3a9   : > { %v1754_v9 = vpop.f32.mrf.mxu0  ;;  %v1804_v50 = vsel %vm1803_vm7, %v3206_v42, 0.0 }
 0x3aa   : > { %v1574_v16 = vpop.f32.mrf.mxu2 }
 0x3ab   : > { %v1652_v28 = vadd.f32 %v1651_v13, %v1574_v16 }
 0x3ad   : > { %v1782_v31 = vadd.f32 %v1754_v9, %v1652_v28 }
 0x3af   : > { %v3204_v39 = vadd.f32 %v1792_v37, %v1782_v31 }
 0x3b1   : > { %v1757_v18 = vpop.f32.mrf.mxu0  ;;  %v1805_v46 = vsel %vm1803_vm7, %v3204_v39, 0.0 }
 0x3b2   : > { %v1577_v3 = vpop.f32.mrf.mxu2  ;;  %v1806_v55 = vadd.f32 %v1805_v46, %v1804_v50 }
 0x3b3   : > { %v1655_v23 = vadd.f32 %v1654_v6, %v1577_v3 }
 0x3b5   : > { %v1783_v34 = vadd.f32 %v1757_v18, %v1655_v23 }
 0x3b7   : > { %v3208_v43 = vadd.f32 %v1792_v37, %v1783_v34 }
 0x3b9   : > { %v1760_v20 = vpop.f32.mrf.mxu0  ;;  %v1807_v51 = vsel %vm1803_vm7, %v3208_v43, 0.0 }
 0x3ba   : > { %v1580_v63 = vpop.f32.mrf.mxu2  ;;  %v1808_v60 = vadd.f32 %v1807_v51, %v1806_v55 }
 0x3bb   : > { %v1658_v32 = vadd.f32 %v1657_v17, %v1580_v63 }
 0x3bd   : > { %v1784_v40 = vadd.f32 %v1760_v20, %v1658_v32 }
 0x3bf   : > { %v3212_v47 = vadd.f32 %v1792_v37, %v1784_v40 }
 0x3c1   : > { %v1763_v21 = vpop.f32.mrf.mxu0  ;;  %v1809_v57 = vsel %vm1803_vm7, %v3212_v47, 0.0 }
 0x3c2   : > { %v1583_v22 = vpop.f32.mrf.mxu2  ;;  %v1810_v5 = vadd.f32 %v1809_v57, %v1808_v60 }
 0x3c3   : > { %v1661_v35 = vadd.f32 %v1660_v15, %v1583_v22 }
 0x3c5   : > { %v1785_v44 = vadd.f32 %v1763_v21, %v1661_v35 }
 0x3c7   : > { %v1797_v52 = vadd.f32 %v1792_v37, %v1785_v44 }
 0x3c9   : > { %v1766_v24 = vpop.f32.mrf.mxu0  ;;  %v1811_v0 = vsel %vm1803_vm7, %v1797_v52, 0.0 }
 0x3ca   : > { %v1586_v7 = vpop.f32.mrf.mxu2  ;;  %v1812_v10 = vadd.f32 %v1811_v0, %v1810_v5 }
 0x3cb   : > { %v1664_v41 = vadd.f32 %v1663_v11, %v1586_v7 }
 0x3cd   : > { %v1786_v48 = vadd.f32 %v1766_v24, %v1664_v41  ;;  %v2447_v24 = vmov 6400.0  }
 0x3ce   : > { %2376 = vrcp.f32 %v2447_v24 }
 0x3cf   : > { %v1798_v58 = vadd.f32 %v1792_v37, %v1786_v48 }
 0x3d1   : > { %v1769_v26 = vpop.f32.mrf.mxu0  ;;  %v1813_v8 = vsel %vm1803_vm7, %v1798_v58, 0.0 }
 0x3d2   : > { %v1589_v27 = vpop.f32.mrf.mxu2  ;;  %v1814_v61 = vadd.f32 %v1813_v8, %v1812_v10 }
 0x3d3   : > { %v1667_v25 = vadd.f32 %v1666_v19, %v1589_v27 }
 0x3d4   : > { %v2377_v7 = vpop.eup %2376 }
 0x3d5   : > { %v1787_v53 = vadd.f32 %v1769_v26, %v1667_v25  ;;  %v1833_v19 = vmul.f32 6400.0, %v2377_v7  ;;  %vm1837_vm8 = vweird.f32 %v2377_v7 }
 0x3d7   : > { %v1799_v2 = vadd.f32 %v1792_v37, %v1787_v53  ;;  %v1834_v26 = vsub.f32 1.0, %v1833_v19 }
 0x3d9   : > { %v1772_v36 = vpop.f32.mrf.mxu0  ;;  %v1815_v13 = vsel %vm1803_vm7, %v1799_v2, 0.0  ;;  %v1835_v30 = vmul.f32 %v2377_v7, %v1834_v26 }
 0x3da   : > { %v1592_v38 = vpop.f32.mrf.mxu2  ;;  %v1816_v18 = vadd.f32 %v1815_v13, %v1814_v61 }
 0x3db   : > { %v1670_v49 = vadd.f32 %v1669_v29, %v1592_v38  ;;  %v1836_v32 = vadd.f32 %v2377_v7, %v1835_v30  ;;  %v1924_v30 = vld [vmem:[%s3410_s7 + $0x8] sm:$0xff] }
 0x3dd   : > { %v1788_v59 = vadd.f32 %v1772_v36, %v1670_v49  ;;  %v1838_v35 = vsel %vm1837_vm8, %v2377_v7, %v1836_v32 }
 0x3df   : > { %v1800_v62 = vadd.f32 %v1792_v37, %v1788_v59 }
 0x3e1   : > { %v1775_v54 = vpop.f32.mrf.mxu0  ;;  %v1817_v16 = vsel %vm1803_vm7, %v1800_v62, 0.0 }
 0x3e2   : > { %v1595_v56 = vpop.f32.mrf.mxu2  ;;  %v1818_v20 = vadd.f32 %v1817_v16, %v1816_v18 }
 0x3e3   : > { %v1673_v1 = vadd.f32 %v1672_v45, %v1595_v56 }
 0x3e5   : > { %v1789_v4 = vadd.f32 %v1775_v54, %v1673_v1 }
 0x3e7   : > { %v1801_v14 = vadd.f32 %v1792_v37, %v1789_v4 }
 0x3e9   : > { %v1778_v9 = vpop.f32.mrf.mxu0  ;;  %v1819_v15 = vsel %vm1803_vm7, %v1801_v14, 0.0 }
 0x3ea   : > { %v1598_v6 = vpop.f32.mrf.mxu2  ;;  %v1820_v11 = vadd.f32 %v1819_v15, %v1818_v20 }
 0x3eb   : > { %v1676_v17 = vadd.f32 %v1675_v12, %v1598_v6 }
 0x3ed   : > { %v1790_v3 = vadd.f32 %v1778_v9, %v1676_v17 }
 0x3ef   : > { %v1802_v63 = vadd.f32 %v1792_v37, %v1790_v3 }
 0x3f1   : > { %v1821_v21 = vsel %vm1803_vm7, %v1802_v63, 0.0 }
 0x3f2   : > { %v1822_v22 = vadd.f32 %v1821_v21, %v1820_v11 }
 0x3f4   : > { %1823 = vadd.xlane.f32.xlu1 %v1822_v22 }
 0x467   : > { %v1824_v27 = vpop.xlane.xlu1 %1823 }
 0x468   : > { %v1825_v28 = vrot.slane %v1824_v27, 4 }
 0x46a   : > { %v1826_v29 = vadd.f32 %v1825_v28, %v1824_v27 }
 0x46c   : > { %v1827_v23 = vrot.slane %v1826_v29, 2 }
 0x46e   : > { %v1828_v31 = vadd.f32 %v1827_v23, %v1826_v29  ;;  %v1923_v29 = vld [vmem:[%s3410_s7] sm:$0xff] }
 0x470   : > { %v1829_v33 = vrot.slane %v1828_v31, 1 }
 0x472   : > { %v1830_v34 = vadd.f32 %v1829_v33, %v1828_v31 }
 0x474   : > { %2267 = vpush %v1830_v34  ;;  %v1925_v34 = vld [vmem:[%s3410_s7 + $0x10] sm:$0xff] }
 0x475   : > { %2269 = vpush %v1838_v35  ;;  %v1926_v35 = vld [vmem:[%s3410_s7 + $0x18] sm:$0xff] }
 0x4a5   : > { %s2268_s17 = spop %2267 }
 0x4a6   : > { %s3226_s18 = spop %2269 }
 0x4a7   : > { %s1840_s22 = smul.f32 %s3226_s18, %s2268_s17  ;;  %s326_s17 = scalar_lea.vmem [#allocation3], %s3293_s10 }
 0x4a8   : > { %s1986_s10 = sshll.u32 %s326_s17, 4  ;;  %s1987_s10 = int_to_ptr.vmem [resolvable:$true] %s1986_s10 }
 0x4a9   : > { %v1841_v36 = vstv %s1840_s22 }
 0x4aa   : > { %v3230_v37 = vsub.f32 %v3206_v42, %v1841_v36  ;;  %v3233_v38 = vsub.f32 %v3204_v39, %v1841_v36  ;;  %v3236_v40 = vsub.f32 %v3208_v43, %v1841_v36  ;;  %v3239_v41 = vsub.f32 %v3212_v47, %v1841_v36 }
 0x4ab   : > { %v3245_v45 = vsub.f32 %v1797_v52, %v1841_v36  ;;  %v3249_v46 = vsub.f32 %v1798_v58, %v1841_v36  ;;  %v3255_v49 = vsub.f32 %v1799_v2, %v1841_v36  ;;  %v3260_v53 = vsub.f32 %v1800_v62, %v1841_v36 }
 0x4ac   : > { %v1852_v44 = vmul.f32 %v3230_v37, %v3230_v37  ;;  %v1853_v25 = vmul.f32 %v3233_v38, %v3233_v38  ;;  %v1854_v42 = vmul.f32 %v3236_v40, %v3236_v40  ;;  %v1855_v39 = vmul.f32 %v3239_v41, %v3239_v41 }
 0x4ad   : > { %v1856_v50 = vmul.f32 %v3245_v45, %v3245_v45  ;;  %v1857_v54 = vmul.f32 %v3249_v46, %v3249_v46  ;;  %v3265_v57 = vsub.f32 %v1801_v14, %v1841_v36  ;;  %v1858_v58 = vmul.f32 %v3255_v49, %v3255_v49 }
 0x4ae   : > { %v1862_v43 = vsel %vm1803_vm7, %v1852_v44, 0.0  ;;  %v1863_v47 = vsel %vm1803_vm7, %v1853_v25, 0.0  ;;  %v1865_v51 = vsel %vm1803_vm7, %v1854_v42, 0.0  ;;  %v1867_v55 = vsel %vm1803_vm7, %v1855_v39, 0.0  ;;  %v1929_v44 = vld [vmem:[%s3410_s7 + $0x30] sm:$0xff] }
 0x4af   : > { %v1864_v48 = vadd.f32 %v1863_v47, %v1862_v43  ;;  %v1869_v59 = vsel %vm1803_vm7, %v1856_v50, 0.0  ;;  %v3270_v60 = vsub.f32 %v1802_v63, %v1841_v36  ;;  %v1859_v0 = vmul.f32 %v3260_v53, %v3260_v53  ;;  %v1927_v36 = vld [vmem:[%s3410_s7 + $0x20] sm:$0xff]  ;;  %v1945_v43 = vld [vmem:[%s3411_s8 + $0x10] sm:$0xff] }
 0x4b0   : > { %v1871_v2 = vsel %vm1803_vm7, %v1857_v54, 0.0  ;;  %v1860_v5 = vmul.f32 %v3265_v57, %v3265_v57  ;;  %v1873_v8 = vsel %vm1803_vm7, %v1858_v58, 0.0  ;;  %v1931_v54 = vld [vmem:[%s3410_s7 + $0x40] sm:$0xff] }
 0x4b1   : > { %v1866_v52 = vadd.f32 %v1865_v51, %v1864_v48  ;;  %v1861_v10 = vmul.f32 %v3270_v60, %v3270_v60  ;;  %v1875_v12 = vsel %vm1803_vm7, %v1859_v0, 0.0  ;;  %v1930_v48 = vld [vmem:[%s3410_s7 + $0x38] sm:$0xff] }
 0x4b2   : > { %v1877_v14 = vsel %vm1803_vm7, %v1860_v5, 0.0 }
 0x4b3   : > { %v1868_v56 = vadd.f32 %v1867_v55, %v1866_v52  ;;  %v1879_v6 = vsel %vm1803_vm7, %v1861_v10, 0.0  ;;  %v1946_v52 = vld [vmem:[%s3411_s8 + $0x18] sm:$0xff] }
 0x4b5   : > { %v1870_v1 = vadd.f32 %v1869_v59, %v1868_v56  ;;  %v1947_v56 = vld [vmem:[%s3411_s8 + $0x20] sm:$0xff]  ;;  %v1948_v59 = vld [vmem:[%s3411_s8 + $0x28] sm:$0xff] }
 0x4b7   : > { %v1872_v4 = vadd.f32 %v1871_v2, %v1870_v1 }
 0x4b9   : > { %v1874_v62 = vadd.f32 %v1873_v8, %v1872_v4  ;;  %v1949_v4 = vld [vmem:[%s3411_s8 + $0x30] sm:$0xff] }
 0x4bb   : > { %v1876_v13 = vadd.f32 %v1875_v12, %v1874_v62  ;;  %v1950_v62 = vld [vmem:[%s3411_s8 + $0x38] sm:$0xff] }
 0x4bd   : > { %v1878_v61 = vadd.f32 %v1877_v14, %v1876_v13  ;;  %v1951_v13 = vld [vmem:[%s3411_s8 + $0x40] sm:$0xff] }
 0x4bf   : > { %v1880_v9 = vadd.f32 %v1879_v6, %v1878_v61  ;;  %v1952_v61 = vld [vmem:[%s3411_s8 + $0x48] sm:$0xff] }
 0x4c1   : > { %1881 = vadd.xlane.f32.xlu2 %v1880_v9 }
 0x534   : > { %v1882_v16 = vpop.xlane.xlu2 %1881 }
 0x535   : > { %v1883_v17 = vrot.slane %v1882_v16, 4 }
 0x537   : > { %v1884_v18 = vadd.f32 %v1883_v17, %v1882_v16 }
 0x539   : > { %v1885_v3 = vrot.slane %v1884_v18, 2 }
 0x53b   : > { %v1886_v15 = vadd.f32 %v1885_v3, %v1884_v18 }
 0x53d   : > { %v1887_v20 = vrot.slane %v1886_v15, 1 }
 0x53f   : > { %v1888_v63 = vadd.f32 %v1887_v20, %v1886_v15 }
 0x541   : > { %2271 = vpush %v1888_v63 }
 0x572   : > { %s2272_s23 = spop %2271 }
 0x573   : > { %s1898_s24 = smul.f32 %s2272_s23, %s3226_s18  ;;  %s1985_s23 = scalar_lea.hbm %s3412_s9, %s2275_s29 }
 0x574   : > { %s1988_s29 = sshll.u32 %s1985_s23, 4  ;;  %s2400_s23 = scalar_lea.hbm %s3412_s9, 160  ;;  %s1989_s29 = int_to_ptr.hbm [resolvable:$true] %s1988_s29 }
 0x575   : > { %s1899_s25 = sadd.f32 1e-05, %s1898_s24  ;;  %s2394_s28 = sshra.s32 %s1989_s29, 4  ;;  %s2395_s28 = int_to_ptr.hbm [resolvable:$true] %s2394_s28 }
 0x576   : > { %s2396_s30 = scalar_lea.hbm %s2395_s28, 80  ;;  %p2401_p0 = scmp.lt.s32.totalorder %s2395_s28, %s3412_s9 }
 0x577   : > { %v1900_v11 = vstv %s1899_s25  ;;  %p2397_p11 = scmp.ne.s32.totalorder %s2395_s28, %s2396_s30  ;;  %p2402_p1 = scmp.lt.s32.totalorder %s2400_s23, %s2396_s30 }
 0x578   : > { %2378 = vrsqrt.f32 %v1900_v11  ;;  %vm1907_vm10 = vweird.f32 %v1900_v11 }
 0x579   : > { %p2398_p12 = pnand %p2397_p11, %p2541_p5  ;;  %p2403_p2 = por %p2402_p1, %p2401_p0 }
 0x57b   : > { %p2399_p13 = pneg %p2398_p12 }
 0x57d   : > { %p2404_p3 = pnand %p2403_p2, %p2399_p13 }
 0x57e   : > { %v2379_v21 = vpop.eup %2378 }
 0x57f   : > { %v1902_v22 = vmul.f32 %v2379_v21, %v1900_v11  ;;  %vm1908_vm9 = vweird.f32 %v2379_v21 }
 0x580   : > { %vm1909_vm11 = vmor %vm1907_vm10, %vm1908_vm9 }
 0x581   : > { %v1903_v24 = vmul.f32 %v2379_v21, %v1902_v22 }
 0x583   : > { %v1904_v7 = vmul.f32 0.5, %v1903_v24 }
 0x585   : > { %v1905_v19 = vsub.f32 1.5, %v1904_v7 }
 0x587   : > { %v1906_v26 = vmul.f32 %v2379_v21, %v1905_v19 }
 0x589   : > { %v1910_v27 = vsel %vm1909_vm11, %v2379_v21, %v1906_v26 }
 0x58a   : > { %2273 = vpush %v1910_v27 }
 0x5bb   : > { %s2274_s27 = spop %2273 }
 0x5bc   : > { %v1912_v28 = vstv %s2274_s27 }
 0x5bd   : > { %v1913_v23 = vmul.f32 %v1912_v28, %v3230_v37  ;;  %v1914_v31 = vmul.f32 %v1912_v28, %v3233_v38  ;;  %v1915_v32 = vmul.f32 %v1912_v28, %v3236_v40  ;;  %v1916_v33 = vmul.f32 %v1912_v28, %v3239_v41  ;;  %v1928_v41 = vld [vmem:[%s3410_s7 + $0x28] sm:$0xff] }
 0x5be   : > { %v1917_v37 = vmul.f32 %v1912_v28, %v3245_v45  ;;  %v1918_v38 = vmul.f32 %v1912_v28, %v3249_v46  ;;  %v1919_v40 = vmul.f32 %v1912_v28, %v3255_v49  ;;  %v1920_v25 = vmul.f32 %v1912_v28, %v3260_v53  ;;  %v1943_v45 = vld [vmem:[%s3411_s8] sm:$0xff]  ;;  %v1944_v46 = vld [vmem:[%s3411_s8 + $0x8] sm:$0xff] }
 0x5bf   : > { %v1933_v42 = vmul.f32 %v1923_v29, %v1913_v23  ;;  %v1934_v39 = vmul.f32 %v1924_v30, %v1914_v31  ;;  %v1921_v47 = vmul.f32 %v1912_v28, %v3265_v57  ;;  %v1935_v49 = vmul.f32 %v1925_v34, %v1915_v32  ;;  %v1932_v57 = vld [vmem:[%s3410_s7 + $0x48] sm:$0xff] }
 0x5c0   : > { %v1936_v50 = vmul.f32 %v1926_v35, %v1916_v33  ;;  %v1937_v51 = vmul.f32 %v1927_v36, %v1917_v37  ;;  %v1922_v53 = vmul.f32 %v1912_v28, %v3270_v60  ;;  %v1938_v55 = vmul.f32 %v1928_v41, %v1918_v38 }
 0x5c1   : > { %v1939_v58 = vmul.f32 %v1929_v44, %v1919_v40  ;;  %v1953_v1 = vadd.f32 %v1943_v45, %v1933_v42  ;;  %v1954_v60 = vadd.f32 %v1944_v46, %v1934_v39  ;;  %v1955_v0 = vadd.f32 %v1945_v43, %v1935_v49 }
 0x5c2   : > { %v1940_v2 = vmul.f32 %v1930_v48, %v1920_v25  ;;  %v1956_v5 = vadd.f32 %v1946_v52, %v1936_v50  ;;  %v1941_v8 = vmul.f32 %v1931_v54, %v1921_v47  ;;  %v1957_v10 = vadd.f32 %v1947_v56, %v1937_v51 }
 0x5c3   : > { %1963 = vst.msk [vmem:[%s326_s17] sm:$0xff] %vm1803_vm7, %v1953_v1  ;;  %v1942_v12 = vmul.f32 %v1932_v57, %v1922_v53  ;;  %v1958_v14 = vadd.f32 %v1948_v59, %v1938_v55  ;;  %v1959_v6 = vadd.f32 %v1949_v4, %v1939_v58 }
 0x5c4   : > { %1964 = vst.msk [vmem:[%s326_s17 + $0x8] sm:$0xff] %vm1803_vm7, %v1954_v60  ;;  %v1960_v9 = vadd.f32 %v1950_v62, %v1940_v2  ;;  %v1961_v16 = vadd.f32 %v1951_v13, %v1941_v8 }
 0x5c5   : > { %1965 = vst.msk [vmem:[%s326_s17 + $0x10] sm:$0xff] %vm1803_vm7, %v1955_v0  ;;  %v1962_v17 = vadd.f32 %v1952_v61, %v1942_v12 }
 0x5c6   : > { %1966 = vst.msk [vmem:[%s326_s17 + $0x18] sm:$0xff] %vm1803_vm7, %v1956_v5 }
 0x5c7   : > { %1967 = vst.msk [vmem:[%s326_s17 + $0x20] sm:$0xff] %vm1803_vm7, %v1957_v10 }
 0x5c8   : > { %1968 = vst.msk [vmem:[%s326_s17 + $0x28] sm:$0xff] %vm1803_vm7, %v1958_v14 }
 0x5c9   : > { %1969 = vst.msk [vmem:[%s326_s17 + $0x30] sm:$0xff] %vm1803_vm7, %v1959_v6 }
 0x5ca   : > { %1970 = vst.msk [vmem:[%s326_s17 + $0x38] sm:$0xff] %vm1803_vm7, %v1960_v9 }
 0x5cb   : > { %1971 = vst.msk [vmem:[%s326_s17 + $0x40] sm:$0xff] %vm1803_vm7, %v1961_v16 }
 0x5cc   : > { %1972 = vst.msk [vmem:[%s326_s17 + $0x48] sm:$0xff] %vm1803_vm7, %v1962_v17 }
 0x5cd   : > { %2407 = shalt.err (!%p2404_p3)
}
 0x5ce   : > { %s2448_s26 = smov 128   ;;  %s2449_s17 = smov 8  }
 0x5cf   : > { %2276 = dma.vmem_to_hbm [thread:$0]  (%p2541_p5), %s1987_s10, 1280, %s1989_s29, %s1974_s15, %s2448_s26, %s2448_s26, %s2449_s17  }
 0x5d0 PF: > { %p2282_p4 = scmp.ge.s32.totalorder %s2442_s14, 2  ;;  %s2003_s27 = sand.u32 1, %s2430_s11  }
 0x5d1   : > { %s2004_s6 = scalar_lea.sflag [#allocation4], %s2003_s27 }
 0x5d2   : > { %p2279_p7 = pnand %p2282_p4, %p2545_p6 }
 0x5d4   : > { %p2280_p8 = pneg %p2279_p7 }
 0x5d6   : > { %2425 = dma.done.wait (%p2280_p8), %s2004_s6, 1280  }
 0x5d7   : > { %2427 = vsyncadd (%p2280_p8), %s2004_s6, 4294966016  ;;  %p20_p9 = scmp.ge.s32.totalorder %s2528_s16, 4   ;;  %s3415_s11 = smov %s2434_s12 }
 0x5d8   : > { %s3416_s12 = smov %s2438_s13  ;;  %s3417_s13 = smov %s2539_s19 }
 0x5d9   : > { %s3418_s14 = smov %s2528_s16  ;;  %22 = sbr.rel (!%p20_p9) target bundleno = 5 (0x5), region = 98 }
 0x5de   :  { %2010 = vsyncpa [#allocation4], 1 }
 0x5df   :  { %2012 = vsyncpa [#allocation4 + $0x1], 1 }

</bundles_post_ra>
